<compile_context>
chip_gen: v6e
topology: v6e:2x2x1
jax: 0.10.0
libtpu: 0.0.40
codegen_flags: <defaults>
</compile_context>

<pallas_src>
import functools

import jax
import jax.numpy as jnp
from jax.experimental import pallas as pl
from jax.experimental.pallas import tpu as pltpu


# Head sizes are fixed by the module definition (64 / 64 / 32).
HEAD_S, HEAD_E, HEAD_C = 64, 64, 32
H_FUSED = HEAD_S + HEAD_E + HEAD_C        # 160
H_PAD = 256                               # fused-head lanes, padded to 2*128
OUT_PAD = 128                             # lane-dense output slab; cols 0/1/2 used


# -----------------------------------------------------------------------------
# Kernel
# -----------------------------------------------------------------------------
def _boundary_kernel(
    x_ref,
    w1_ref, b1_ref,          # encoder: input_dim -> hidden_dim
    w2_ref, b2_ref,          # encoder: hidden_dim -> hidden_dim // 2
    wh1_ref, bh1_ref,        # fused head layer 1: half -> H_PAD (start|end|conf, zero-padded)
    wh2_ref, bh2_ref,        # fused head layer 2: H_PAD -> OUT_PAD (block-diag into cols 0/1/2)
    out_ref,                 # [bb, OUT_PAD] sigmoid outputs (out_dtype)
    *,
    compute_dtype,
    approx_sigmoid,
):
    def mm(a, w_ref):
        # MXU matmul with compute_dtype operands and f32 accumulation.
        return jnp.dot(a.astype(compute_dtype), w_ref[...],
                       preferred_element_type=jnp.float32)

    x = x_ref[...]

    # ---- encoder ----  (Dropout(0.1) is identity in eval mode)
    h1 = jnp.maximum(mm(x, w1_ref) + b1_ref[...], 0.0)
    feats = jnp.maximum(mm(h1, w2_ref) + b2_ref[...], 0.0)

    # ---- fused heads ----
    # One matmul for all three head hidden layers; padded lanes are relu(0)=0.
    hh = jnp.maximum(mm(feats, wh1_ref) + bh1_ref[...], 0.0)
    # One block-diagonal matmul replaces the three N=1 output layers.
    logits = mm(hh, wh2_ref) + bh2_ref[...]

    if approx_sigmoid:
        # exp + approx reciprocal both live on the EUP slot (nearly free).
        sig = pl.reciprocal(1.0 + jnp.exp(-logits), approx=True)
    else:
        sig = jax.nn.sigmoid(logits)
    out_ref[...] = sig.astype(out_ref.dtype)


# -----------------------------------------------------------------------------
# One-time parameter packing (call at param-load time, NOT per forward call)
# -----------------------------------------------------------------------------
def _fuse_head_params(p):
    """Concatenate / block-diagonalize the three head weight pairs (f32)."""
    half = p["ws1"].shape[0]

    wh1 = jnp.zeros((half, H_PAD), jnp.float32)
    wh1 = (wh1.at[:, 0:HEAD_S].set(p["ws1"])
              .at[:, HEAD_S:HEAD_S + HEAD_E].set(p["we1"])
              .at[:, HEAD_S + HEAD_E:H_FUSED].set(p["wc1"]))
    bh1 = jnp.zeros((1, H_PAD), jnp.float32)
    bh1 = (bh1.at[:, 0:HEAD_S].set(p["bs1"])
              .at[:, HEAD_S:HEAD_S + HEAD_E].set(p["be1"])
              .at[:, HEAD_S + HEAD_E:H_FUSED].set(p["bc1"]))

    wh2 = jnp.zeros((H_PAD, OUT_PAD), jnp.float32)
    wh2 = (wh2.at[0:HEAD_S, 0:1].set(p["ws2"])
              .at[HEAD_S:HEAD_S + HEAD_E, 1:2].set(p["we2"])
              .at[HEAD_S + HEAD_E:H_FUSED, 2:3].set(p["wc2"]))
    bh2 = jnp.zeros((1, OUT_PAD), jnp.float32)
    bh2 = (bh2.at[:, 0:1].set(p["bs2"])
              .at[:, 1:2].set(p["be2"])
              .at[:, 2:3].set(p["bc2"]))
    return wh1, bh1, wh2, bh2


def pack_params(params, compute_dtype=jnp.bfloat16):
    """Fuse head weights and pre-cast matmul operands ONCE.

    Returns a dict of arrays ready for `boundary_regression_forward`.
    Matmul weights are stored in `compute_dtype` (bf16 default -> bf16-native
    MXU on v5e/v6e/v7x); biases stay f32 for the f32 epilogue.
    """
    wh1, bh1, wh2, bh2 = _fuse_head_params(params)
    return {
        "w1": params["w1"].astype(compute_dtype),
        "b1": params["b1"].astype(jnp.float32),
        "w2": params["w2"].astype(compute_dtype),
        "b2": params["b2"].astype(jnp.float32),
        "wh1": wh1.astype(compute_dtype),
        "bh1": bh1,
        "wh2": wh2.astype(compute_dtype),
        "bh2": bh2,
    }


# -----------------------------------------------------------------------------
# Batch-tile selection (core-count aware, VMEM-budget clamped)
# -----------------------------------------------------------------------------
def _num_tensorcores():
    """Best-effort TensorCore count per chip (1 on v5e/v6e, 2 on v7x)."""
    try:
        info = pltpu.get_tpu_info()
        for attr in ("num_cores", "core_count", "num_tensorcores",
                     "tensorcore_count"):
            v = getattr(info, attr, None)
            if isinstance(v, int) and v > 0:
                return v
    except Exception:
        pass
    try:
        v = getattr(jax.devices()[0], "num_cores", None)
        if isinstance(v, int) and v > 0:
            return v
    except Exception:
        pass
    return 1


def _pick_block_b(B, block_b, num_cores, input_dim, hidden_dim, half,
                  out_itemsize, vmem_budget=24 << 20):
    """Large batch tiles; split only when it helps (multi-TC) or VMEM demands."""
    # Rough per-row VMEM bytes: double-buffered x (f32 in HBM) + double-buffered
    # output slab + f32 intermediates (h1, feats, hh, logits).
    per_row = (2 * input_dim * 4
               + 2 * OUT_PAD * out_itemsize
               + 4 * (hidden_dim + half + H_PAD + OUT_PAD))
    bb_cap = max(8, (vmem_budget // max(per_row, 1)) // 8 * 8)

    bb = min(block_b, B, bb_cap)
    if num_cores > 1 and B > 8:
        # Round the block count up to a multiple of the core count so every
        # TensorCore gets equal work under dimension_semantics=("parallel",).
        blocks = pl.cdiv(B, bb)
        if blocks % num_cores:
            blocks = ((blocks + num_cores - 1) // num_cores) * num_cores
            bb = pl.cdiv(B, blocks)
    bb = max(8, ((bb + 7) // 8) * 8)     # multiple of 8 sublanes
    return bb


# -----------------------------------------------------------------------------
# Forward wrapper
# -----------------------------------------------------------------------------
def boundary_regression_forward(x, packed, *, block_b=2048,
                                out_dtype=jnp.bfloat16,
                                approx_sigmoid=None):
    """Full MLP forward pass inside a single Pallas kernel.

    x:       [B, input_dim] float32 (cast to the matmul dtype inside the kernel)
    packed:  output of `pack_params` (pre-fused, pre-cast weights)
    out_dtype: dtype of the lane-dense [B, 128] output slab written to HBM
               (bf16 default halves writeback traffic; sigmoid outputs in [0,1]
               tolerate it). Sliced/upcast in the wrapper.
    Returns dict with 'start_offset', 'end_offset', 'confidence', each [B, 1] f32.
    """
    B, input_dim = x.shape
    compute_dtype = packed["w1"].dtype
    hidden_dim = packed["w1"].shape[1]
    half = packed["w2"].shape[1]
    if approx_sigmoid is None:
        approx_sigmoid = jnp.dtype(compute_dtype) != jnp.dtype(jnp.float32)

    bb = _pick_block_b(B, block_b, _num_tensorcores(), input_dim, hidden_dim,
                       half, jnp.dtype(out_dtype).itemsize)
    grid = (pl.cdiv(B, bb),)
    # If B is not a multiple of bb the last block is partial; rows are
    # independent (no cross-row reduction), so out-of-range rows are harmless
    # and their stores are masked.

    weights = [packed[k] for k in
               ("w1", "b1", "w2", "b2", "wh1", "bh1", "wh2", "bh2")]

    def full_spec(arr):
        # Weights / biases: whole array resident; constant block index across
        # the grid means Pallas does not re-DMA them per step.
        return pl.BlockSpec(arr.shape, lambda i, n=arr.ndim: (0,) * n)

    in_specs = (
        [pl.BlockSpec((bb, input_dim), lambda i: (i, 0))]
        + [full_spec(p) for p in weights]
    )
    out_specs = pl.BlockSpec((bb, OUT_PAD), lambda i: (i, 0))
    out_shape = jax.ShapeDtypeStruct((B, OUT_PAD), out_dtype)

    out = pl.pallas_call(
        functools.partial(_boundary_kernel,
                          compute_dtype=compute_dtype,
                          approx_sigmoid=bool(approx_sigmoid)),
        out_shape=out_shape,
        grid_spec=pltpu.PrefetchScalarGridSpec(
            num_scalar_prefetch=0,
            grid=grid,
            in_specs=in_specs,
            out_specs=out_specs,
        ),
        compiler_params=pltpu.CompilerParams(
            dimension_semantics=("parallel",),
        ),
    )(x, *weights)

    # Slice first, then upcast (avoids touching the full slab again in f32).
    return {
        "start_offset": out[:, 0:1].astype(jnp.float32),
        "end_offset": out[:, 1:2].astype(jnp.float32),
        "confidence": out[:, 2:3].astype(jnp.float32),
    }


# -----------------------------------------------------------------------------
# Test utilities
# -----------------------------------------------------------------------------
def init_params(key, input_dim, hidden_dim):
    """Deterministic synthetic parameter init (shapes from module __init__)."""
    half = hidden_dim // 2
    shapes = {
        "w1": (input_dim, hidden_dim), "b1": (1, hidden_dim),
        "w2": (hidden_dim, half),      "b2": (1, half),
        "ws1": (half, HEAD_S),         "bs1": (1, HEAD_S),
        "ws2": (HEAD_S, 1),            "bs2": (1, 1),
        "we1": (half, HEAD_E),         "be1": (1, HEAD_E),
        "we2": (HEAD_E, 1),            "be2": (1, 1),
        "wc1": (half, HEAD_C),         "bc1": (1, HEAD_C),
        "wc2": (HEAD_C, 1),            "bc2": (1, 1),
    }
    params = {}
    for name, shape in sorted(shapes.items()):
        key, sub = jax.random.split(key)
        fan_in = shape[0] if name.startswith("w") else shape[1]
        scale = 1.0 / jnp.sqrt(jnp.float32(fan_in))
        params[name] = scale * jax.random.normal(sub, shape, dtype=jnp.float32)
    return params


def reference_forward(x, p):
    """Plain-JAX reference for correctness checking."""
    h = jnp.maximum(x @ p["w1"] + p["b1"], 0.0)
    f = jnp.maximum(h @ p["w2"] + p["b2"], 0.0)

    def head(wa, ba, wb, bb):
        hh = jnp.maximum(f @ wa + ba, 0.0)
        return jax.nn.sigmoid(hh @ wb + bb)

    return {
        "start_offset": head(p["ws1"], p["bs1"], p["ws2"], p["bs2"]),
        "end_offset": head(p["we1"], p["be1"], p["we2"], p["be2"]),
        "confidence": head(p["wc1"], p["bc1"], p["wc2"], p["bc2"]),
    }


if __name__ == "__main__":
    # Small shapes consistent with the module: input_dim=64, hidden_dim=32.
    INPUT_DIM = 64
    HIDDEN_DIM = 32
    BATCH = 256

    key = jax.random.PRNGKey(0)
    key, xkey = jax.random.split(key)
    x = jax.random.normal(xkey, (BATCH, INPUT_DIM), dtype=jnp.float32)
    params = init_params(key, INPUT_DIM, HIDDEN_DIM)
    ref = reference_forward(x, params)

    # --- strict-accuracy path: f32 MXU operands, f32 slab, exact sigmoid ---
    packed_f32 = pack_params(params, compute_dtype=jnp.float32)
    out = boundary_regression_forward(x, packed_f32, out_dtype=jnp.float32)
    out = jax.tree_util.tree_map(jax.block_until_ready, out)
    for k in ("start_offset", "end_offset", "confidence"):
        assert out[k].shape == (BATCH, 1), (k, out[k].shape)
        err = float(jnp.max(jnp.abs(out[k] - ref[k])))
        assert err < 1e-5, (k, err)

    # --- default perf path: bf16 operands, bf16 slab, EUP sigmoid ---
    packed = pack_params(params)                       # bf16 default
    out_bf = boundary_regression_forward(x, packed)    # bf16 out_dtype default
    out_bf = jax.tree_util.tree_map(jax.block_until_ready, out_bf)
    for k in ("start_offset", "end_offset", "confidence"):
        assert out_bf[k].shape == (BATCH, 1), (k, out_bf[k].shape)
        err = float(jnp.max(jnp.abs(out_bf[k] - ref[k])))
        assert err < 0.1, (k, err)

    # TODO(synk): train-mode Dropout(0.1) (stochastic masking) is not
    # implemented; this kernel reproduces the deterministic eval-mode forward.
    print("KERNEL_OK")
</pallas_src>

<mosaic_0001>
module attributes {stable_mosaic.version = 11 : i64} {
  func.func @_boundary_kernel(%arg0: i32, %arg1: memref<256x64xf32, #tpu.memory_space<vmem>>, %arg2: memref<64x32xf32, #tpu.memory_space<vmem>>, %arg3: memref<1x32xf32, #tpu.memory_space<vmem>>, %arg4: memref<32x16xf32, #tpu.memory_space<vmem>>, %arg5: memref<1x16xf32, #tpu.memory_space<vmem>>, %arg6: memref<16x256xf32, #tpu.memory_space<vmem>>, %arg7: memref<1x256xf32, #tpu.memory_space<vmem>>, %arg8: memref<256x128xf32, #tpu.memory_space<vmem>>, %arg9: memref<1x128xf32, #tpu.memory_space<vmem>>, %arg10: memref<256x128xf32, #tpu.memory_space<vmem>>) attributes {dimension_semantics = [#tpu.dimension_semantics<parallel>], iteration_bounds = array<i64: 1>, scalar_prefetch = 0 : i64, scratch_operands = 0 : i64, tpu.core_type = #tpu.core_type<tc>, window_params = [{transform_indices = @transform_0, window_bounds = array<i64: 256, 64>}, {pipeline_mode = #tpu.pipeline_mode<synchronous>, transform_indices = @transform_1, window_bounds = array<i64: 64, 32>}, {pipeline_mode = #tpu.pipeline_mode<synchronous>, transform_indices = @transform_2, window_bounds = array<i64: 1, 32>}, {pipeline_mode = #tpu.pipeline_mode<synchronous>, transform_indices = @transform_3, window_bounds = array<i64: 32, 16>}, {pipeline_mode = #tpu.pipeline_mode<synchronous>, transform_indices = @transform_4, window_bounds = array<i64: 1, 16>}, {pipeline_mode = #tpu.pipeline_mode<synchronous>, transform_indices = @transform_5, window_bounds = array<i64: 16, 256>}, {pipeline_mode = #tpu.pipeline_mode<synchronous>, transform_indices = @transform_6, window_bounds = array<i64: 1, 256>}, {pipeline_mode = #tpu.pipeline_mode<synchronous>, transform_indices = @transform_7, window_bounds = array<i64: 256, 128>}, {pipeline_mode = #tpu.pipeline_mode<synchronous>, transform_indices = @transform_8, window_bounds = array<i64: 1, 128>}, {transform_indices = @transform_9, window_bounds = array<i64: 256, 128>}]} {
    %c0 = arith.constant 0 : index
    %c0_0 = arith.constant 0 : index
    %0 = vector.load %arg1[%c0, %c0_0] : memref<256x64xf32, #tpu.memory_space<vmem>>, vector<256x64xf32>
    %c0_1 = arith.constant 0 : index
    %c0_2 = arith.constant 0 : index
    %1 = vector.load %arg2[%c0_1, %c0_2] : memref<64x32xf32, #tpu.memory_space<vmem>>, vector<64x32xf32>
    %cst = arith.constant dense<0.000000e+00> : vector<256x32xf32>
    %2 = tpu.matmul %0, %1, %cst {dimension_numbers = #tpu.dot_dimension_numbers<[1], [0], [0], [1], [0, 0, 1, 1], [], []>} : vector<256x64xf32>, vector<64x32xf32>, vector<256x32xf32> -> vector<256x32xf32>
    %c0_3 = arith.constant 0 : index
    %c0_4 = arith.constant 0 : index
    %3 = vector.load %arg3[%c0_3, %c0_4] : memref<1x32xf32, #tpu.memory_space<vmem>>, vector<1x32xf32>
    %4 = vector.broadcast %3 : vector<1x32xf32> to vector<256x32xf32>
    %5 = arith.addf %2, %4 : vector<256x32xf32>
    %cst_5 = arith.constant 0.000000e+00 : f32
    %6 = vector.broadcast %cst_5 : f32 to vector<256x32xf32>
    %7 = arith.maximumf %5, %6 : vector<256x32xf32>
    %c0_6 = arith.constant 0 : index
    %c0_7 = arith.constant 0 : index
    %8 = vector.load %arg4[%c0_6, %c0_7] : memref<32x16xf32, #tpu.memory_space<vmem>>, vector<32x16xf32>
    %cst_8 = arith.constant dense<0.000000e+00> : vector<256x16xf32>
    %9 = tpu.matmul %7, %8, %cst_8 {dimension_numbers = #tpu.dot_dimension_numbers<[1], [0], [0], [1], [0, 0, 1, 1], [], []>} : vector<256x32xf32>, vector<32x16xf32>, vector<256x16xf32> -> vector<256x16xf32>
    %c0_9 = arith.constant 0 : index
    %c0_10 = arith.constant 0 : index
    %10 = vector.load %arg5[%c0_9, %c0_10] : memref<1x16xf32, #tpu.memory_space<vmem>>, vector<1x16xf32>
    %11 = vector.broadcast %10 : vector<1x16xf32> to vector<256x16xf32>
    %12 = arith.addf %9, %11 : vector<256x16xf32>
    %cst_11 = arith.constant 0.000000e+00 : f32
    %13 = vector.broadcast %cst_11 : f32 to vector<256x16xf32>
    %14 = arith.maximumf %12, %13 : vector<256x16xf32>
    %c0_12 = arith.constant 0 : index
    %c0_13 = arith.constant 0 : index
    %15 = vector.load %arg6[%c0_12, %c0_13] : memref<16x256xf32, #tpu.memory_space<vmem>>, vector<16x256xf32>
    %cst_14 = arith.constant dense<0.000000e+00> : vector<256x256xf32>
    %16 = tpu.matmul %14, %15, %cst_14 {dimension_numbers = #tpu.dot_dimension_numbers<[1], [0], [0], [1], [0, 0, 1, 1], [], []>} : vector<256x16xf32>, vector<16x256xf32>, vector<256x256xf32> -> vector<256x256xf32>
    %c0_15 = arith.constant 0 : index
    %c0_16 = arith.constant 0 : index
    %17 = vector.load %arg7[%c0_15, %c0_16] : memref<1x256xf32, #tpu.memory_space<vmem>>, vector<1x256xf32>
    %18 = vector.broadcast %17 : vector<1x256xf32> to vector<256x256xf32>
    %19 = arith.addf %16, %18 : vector<256x256xf32>
    %cst_17 = arith.constant 0.000000e+00 : f32
    %20 = vector.broadcast %cst_17 : f32 to vector<256x256xf32>
    %21 = arith.maximumf %19, %20 : vector<256x256xf32>
    %c0_18 = arith.constant 0 : index
    %c0_19 = arith.constant 0 : index
    %22 = vector.load %arg8[%c0_18, %c0_19] : memref<256x128xf32, #tpu.memory_space<vmem>>, vector<256x128xf32>
    %cst_20 = arith.constant dense<0.000000e+00> : vector<256x128xf32>
    %23 = tpu.matmul %21, %22, %cst_20 {dimension_numbers = #tpu.dot_dimension_numbers<[1], [0], [0], [1], [0, 0, 1, 1], [], []>} : vector<256x256xf32>, vector<256x128xf32>, vector<256x128xf32> -> vector<256x128xf32>
    %c0_21 = arith.constant 0 : index
    %c0_22 = arith.constant 0 : index
    %24 = vector.load %arg9[%c0_21, %c0_22] : memref<1x128xf32, #tpu.memory_space<vmem>>, vector<1x128xf32>
    %25 = vector.broadcast %24 : vector<1x128xf32> to vector<256x128xf32>
    %26 = arith.addf %23, %25 : vector<256x128xf32>
    %27 = arith.negf %26 : vector<256x128xf32>
    %28 = math.exp %27 : vector<256x128xf32>
    %cst_23 = arith.constant 1.000000e+00 : f32
    %29 = vector.broadcast %cst_23 : f32 to vector<256x128xf32>
    %30 = arith.addf %29, %28 : vector<256x128xf32>
    %31 = arith.divf %29, %30 : vector<256x128xf32>
    %c0_24 = arith.constant 0 : index
    %c0_25 = arith.constant 0 : index
    %32 = vector.load %arg10[%c0_24, %c0_25] : memref<256x128xf32, #tpu.memory_space<vmem>>, vector<256x128xf32>
    tpu.vector_store %arg10[%c0_24, %c0_25], %31 {strides = array<i32>} : memref<256x128xf32, #tpu.memory_space<vmem>>, vector<256x128xf32>,
    return
  }
  func.func @transform_0(%arg0: i32) -> (i32, i32) {
    %c0_i32 = arith.constant 0 : i32
    %c0_i32_0 = arith.constant 0 : i32
    return %arg0, %c0_i32 : i32, i32
  }
  func.func @transform_1(%arg0: i32) -> (i32, i32) {
    %c0_i32 = arith.constant 0 : i32
    %c0_i32_0 = arith.constant 0 : i32
    %c0_i32_1 = arith.constant 0 : i32
    return %c0_i32, %c0_i32_0 : i32, i32
  }
  func.func @transform_2(%arg0: i32) -> (i32, i32) {
    %c0_i32 = arith.constant 0 : i32
    %c0_i32_0 = arith.constant 0 : i32
    %c0_i32_1 = arith.constant 0 : i32
    return %c0_i32, %c0_i32_0 : i32, i32
  }
  func.func @transform_3(%arg0: i32) -> (i32, i32) {
    %c0_i32 = arith.constant 0 : i32
    %c0_i32_0 = arith.constant 0 : i32
    %c0_i32_1 = arith.constant 0 : i32
    return %c0_i32, %c0_i32_0 : i32, i32
  }
  func.func @transform_4(%arg0: i32) -> (i32, i32) {
    %c0_i32 = arith.constant 0 : i32
    %c0_i32_0 = arith.constant 0 : i32
    %c0_i32_1 = arith.constant 0 : i32
    return %c0_i32, %c0_i32_0 : i32, i32
  }
  func.func @transform_5(%arg0: i32) -> (i32, i32) {
    %c0_i32 = arith.constant 0 : i32
    %c0_i32_0 = arith.constant 0 : i32
    %c0_i32_1 = arith.constant 0 : i32
    return %c0_i32, %c0_i32_0 : i32, i32
  }
  func.func @transform_6(%arg0: i32) -> (i32, i32) {
    %c0_i32 = arith.constant 0 : i32
    %c0_i32_0 = arith.constant 0 : i32
    %c0_i32_1 = arith.constant 0 : i32
    return %c0_i32, %c0_i32_0 : i32, i32
  }
  func.func @transform_7(%arg0: i32) -> (i32, i32) {
    %c0_i32 = arith.constant 0 : i32
    %c0_i32_0 = arith.constant 0 : i32
    %c0_i32_1 = arith.constant 0 : i32
    return %c0_i32, %c0_i32_0 : i32, i32
  }
  func.func @transform_8(%arg0: i32) -> (i32, i32) {
    %c0_i32 = arith.constant 0 : i32
    %c0_i32_0 = arith.constant 0 : i32
    %c0_i32_1 = arith.constant 0 : i32
    return %c0_i32, %c0_i32_0 : i32, i32
  }
  func.func @transform_9(%arg0: i32) -> (i32, i32) {
    %c0_i32 = arith.constant 0 : i32
    %c0_i32_0 = arith.constant 0 : i32
    return %arg0, %c0_i32 : i32, i32
  }
}

</mosaic_0001>

<bundles_post_ra>
// kernel: tpu_custom_call.1
= control target key start
LH: loop header
LB: loop body
LE: loop exit
PB: predicated region body
PF: predicated region fallthrough
CT: control target
= control target key end

     0   :  { %vm80_vm0 = vcmask 523264   ;;  %s3041_s0 = inlined_call_operand.vmem [shape: f32[256,64], index: 0, kind: input, shape index: {}]   ;;  %s3042_s1 = inlined_call_operand.vmem [shape: f32[64,32], index: 1, kind: input, shape index: {}]   ;;  %s3043_s2 = inlined_call_operand.vmem [shape: f32[1,32], index: 2, kind: input, shape index: {}]   ;;  %s3044_s3 = inlined_call_operand.vmem [shape: f32[32,16], index: 3, kind: input, shape index: {}]   ;;  %s3045_s4 = inlined_call_operand.vmem [shape: f32[1,16], index: 4, kind: input, shape index: {}]   ;;  %s3046_s5 = inlined_call_operand.vmem [shape: f32[16,256], index: 5, kind: input, shape index: {}]   ;;  %s3047_s6 = inlined_call_operand.vmem [shape: f32[1,256], index: 6, kind: input, shape index: {}]   ;;  %s3048_s7 = inlined_call_operand.vmem [shape: f32[256,128], index: 7, kind: input, shape index: {}]   ;;  %s3049_s8 = inlined_call_operand.vmem [shape: f32[1,128], index: 8, kind: input, shape index: {}]   ;;  %s3050_s9 = inlined_call_operand.hbm [shape: f32[256,128], index: 9, kind: output, shape index: {}]  }
   0x1   :  { %v72_v0 = vld [vmem:[%s3042_s1 + $0x38] sm:$0xff]  ;;  %v71_v1 = vld [vmem:[%s3042_s1 + $0x30] sm:$0xff]  ;;  %v70_v2 = vld [vmem:[%s3042_s1 + $0x28] sm:$0xff] }
   0x2   :  { %1944 = vmatprep.subr.mxu0 %v72_v0  ;;  %v33_v3 = vld [vmem:[%s3041_s0] sm:$0xff]  ;;  %v68_v5 = vld [vmem:[%s3042_s1 + $0x18] sm:$0xff]  ;;  %v67_v6 = vld [vmem:[%s3042_s1 + $0x10] sm:$0xff] }
   0x3   :  { %1945 = vmatpush3.msra.mxu0 %v72_v0  ;;  %1960 = vmatprep.mubr.msk.f32.mxu0 %vm80_vm0, %v33_v3  ;;  %v69_v4 = vld [vmem:[%s3042_s1 + $0x20] sm:$0xff]  ;;  %v66_v7 = vld [vmem:[%s3042_s1 + $0x8] sm:$0xff] }
   0x4   :  { %1946 = vmatprep.subr.mxu0 %v71_v1  ;;  %v65_v8 = vld [vmem:[%s3042_s1] sm:$0xff] }
   0x5   :  { %1947 = vmatpush3.msra.mxu0 %v71_v1 }
   0x6   :  { %1948 = vmatprep.subr.mxu0 %v70_v2 }
   0x7   :  { %1949 = vmatpush3.msra.mxu0 %v70_v2 }
   0x8   :  { %1950 = vmatprep.subr.mxu0 %v69_v4 }
   0x9   :  { %1951 = vmatpush3.msra.mxu0 %v69_v4 }
   0xa   :  { %1952 = vmatprep.subr.mxu0 %v68_v5 }
   0xb   :  { %1953 = vmatpush3.msra.mxu0 %v68_v5 }
   0xc   :  { %1954 = vmatprep.subr.mxu0 %v67_v6 }
   0xd   :  { %1955 = vmatpush3.msra.mxu0 %v67_v6 }
   0xe   :  { %1956 = vmatprep.subr.mxu0 %v66_v7 }
   0xf   :  { %14 = vsyncpa [#allocation3], 0  ;;  %1957 = vmatpush3.msra.mxu0 %v66_v7  ;;  %v34_v9 = vld [vmem:[%s3041_s0 + $0x8] sm:$0xff]  ;;  %v35_v10 = vld [vmem:[%s3041_s0 + $0x10] sm:$0xff]  ;;  %vm445_vm1 = vcmask 261120   ;;  %vm815_vm2 = vcmask 130048  }
  0x10   :  { %1958 = vmatprep.subr.mxu0 %v65_v8  ;;  %v36_v11 = vld [vmem:[%s3041_s0 + $0x18] sm:$0xff]  ;;  %v37_v12 = vld [vmem:[%s3041_s0 + $0x20] sm:$0xff]  ;;  %v38_v13 = vld [vmem:[%s3041_s0 + $0x28] sm:$0xff] }
  0x11   :  { %1959 = vmatpush3.msra.mxu0 %v65_v8  ;;  %v39_v14 = vld [vmem:[%s3041_s0 + $0x30] sm:$0xff]  ;;  %v40_v15 = vld [vmem:[%s3041_s0 + $0x38] sm:$0xff]  ;;  %v41_v16 = vld [vmem:[%s3041_s0 + $0x40] sm:$0xff] }
  0x12   :  { %1961 = vmatmul.mubr.msk.f32.vlgmr.msra.gmra.mxu0 %vm80_vm0, %v34_v9  ;;  %v42_v17 = vld [vmem:[%s3041_s0 + $0x48] sm:$0xff]  ;;  %v43_v18 = vld [vmem:[%s3041_s0 + $0x50] sm:$0xff]  ;;  %v44_v19 = vld [vmem:[%s3041_s0 + $0x58] sm:$0xff] }
  0x13   :  { %1963 = vmatprep.mubr.msk.f32.mxu0 %vm80_vm0, %v35_v10  ;;  %v45_v20 = vld [vmem:[%s3041_s0 + $0x60] sm:$0xff]  ;;  %v46_v21 = vld [vmem:[%s3041_s0 + $0x68] sm:$0xff]  ;;  %v47_v22 = vld [vmem:[%s3041_s0 + $0x70] sm:$0xff] }
  0x14   :  { %v48_v23 = vld [vmem:[%s3041_s0 + $0x78] sm:$0xff]  ;;  %v49_v24 = vld [vmem:[%s3041_s0 + $0x80] sm:$0xff]  ;;  %v50_v25 = vld [vmem:[%s3041_s0 + $0x88] sm:$0xff] }
  0x15   :  { %v51_v26 = vld [vmem:[%s3041_s0 + $0x90] sm:$0xff]  ;;  %v52_v27 = vld [vmem:[%s3041_s0 + $0x98] sm:$0xff]  ;;  %v53_v28 = vld [vmem:[%s3041_s0 + $0xa0] sm:$0xff] }
  0x16   :  { %1964 = vmatmul.mubr.msk.f32.gmra.mxu0 %vm80_vm0, %v36_v11  ;;  %v54_v29 = vld [vmem:[%s3041_s0 + $0xa8] sm:$0xff]  ;;  %v55_v30 = vld [vmem:[%s3041_s0 + $0xb0] sm:$0xff]  ;;  %v56_v31 = vld [vmem:[%s3041_s0 + $0xb8] sm:$0xff] }
  0x17   :  { %1966 = vmatprep.mubr.msk.f32.mxu0 %vm80_vm0, %v37_v12  ;;  %v57_v32 = vld [vmem:[%s3041_s0 + $0xc0] sm:$0xff]  ;;  %v58_v33 = vld [vmem:[%s3041_s0 + $0xc8] sm:$0xff]  ;;  %v59_v34 = vld [vmem:[%s3041_s0 + $0xd0] sm:$0xff] }
  0x18   :  { %v60_v35 = vld [vmem:[%s3041_s0 + $0xd8] sm:$0xff]  ;;  %v61_v36 = vld [vmem:[%s3041_s0 + $0xe0] sm:$0xff]  ;;  %v62_v37 = vld [vmem:[%s3041_s0 + $0xe8] sm:$0xff] }
  0x19   :  { %v63_v38 = vld [vmem:[%s3041_s0 + $0xf0] sm:$0xff]  ;;  %v64_v39 = vld [vmem:[%s3041_s0 + $0xf8] sm:$0xff]  ;;  %v435_v42 = vld [vmem:[%s3044_s3 + $0x8] sm:$0xff] }
  0x1a   :  { %1967 = vmatmul.mubr.msk.f32.gmra.mxu0 %vm80_vm0, %v38_v13  ;;  %v437_v40 = vld [vmem:[%s3044_s3 + $0x18] sm:$0xff]  ;;  %v436_v41 = vld [vmem:[%s3044_s3 + $0x10] sm:$0xff]  ;;  %v434_v43 = vld [vmem:[%s3044_s3] sm:$0xff] }
  0x1b   :  { %1969 = vmatprep.mubr.msk.f32.mxu0 %vm80_vm0, %v39_v14  ;;  %2008 = vmatprep.subr.mxu1 %v437_v40  ;;  %v802_v44 = vld [vmem:[%s3046_s5 + $0x18] sm:$0xff]  ;;  %v2506_v45 = vld [vmem:[%s3043_s2] ss:$0 sm:$0xff]  ;;  %v801_v55 = vld [vmem:[%s3046_s5 + $0x10] sm:$0xff] }
  0x1c   :  { %2009 = vmatpush3.msra.mxu1 %v437_v40  ;;  %v800_v57 = vld [vmem:[%s3046_s5 + $0x8] sm:$0xff]  ;;  %v799_v60 = vld [vmem:[%s3046_s5] sm:$0xff] }
  0x1d   :  { %2010 = vmatprep.subr.mxu1 %v436_v41 }
  0x1e   :  { %1970 = vmatmul.mubr.msk.f32.gmra.mxu0 %vm80_vm0, %v40_v15  ;;  %2011 = vmatpush3.msra.mxu1 %v436_v41 }
  0x1f   :  { %1972 = vmatprep.mubr.msk.f32.mxu0 %vm80_vm0, %v41_v16  ;;  %2012 = vmatprep.subr.mxu1 %v435_v42 }
  0x20   :  { %2013 = vmatpush3.msra.mxu1 %v435_v42 }
  0x21   :  { %2014 = vmatprep.subr.mxu1 %v434_v43 }
  0x22   :  { %1973 = vmatmul.mubr.msk.f32.gmra.mxu0 %vm80_vm0, %v42_v17  ;;  %2015 = vmatpush3.msra.mxu1 %v434_v43 }
  0x23   :  { %1975 = vmatprep.mubr.msk.f32.mxu0 %vm80_vm0, %v43_v18  ;;  %940 = vmatprep.subr.mxu1 %v802_v44 }
  0x26   :  { %1976 = vmatmul.mubr.msk.f32.gmra.mxu0 %vm80_vm0, %v44_v19 }
  0x27   :  { %1978 = vmatprep.mubr.msk.f32.mxu0 %vm80_vm0, %v45_v20 }
  0x2a   :  { %1979 = vmatmul.mubr.msk.f32.gmra.mxu0 %vm80_vm0, %v46_v21 }
  0x2b   :  { %1981 = vmatprep.mubr.msk.f32.mxu0 %vm80_vm0, %v47_v22 }
  0x2e   :  { %1982 = vmatmul.mubr.msk.f32.gmra.mxu0 %vm80_vm0, %v48_v23 }
  0x2f   :  { %1984 = vmatprep.mubr.msk.f32.mxu0 %vm80_vm0, %v49_v24 }
  0x32   :  { %1985 = vmatmul.mubr.msk.f32.gmra.mxu0 %vm80_vm0, %v50_v25 }
  0x33   :  { %1987 = vmatprep.mubr.msk.f32.mxu0 %vm80_vm0, %v51_v26 }
  0x36   :  { %1988 = vmatmul.mubr.msk.f32.gmra.mxu0 %vm80_vm0, %v52_v27 }
  0x37   :  { %1990 = vmatprep.mubr.msk.f32.mxu0 %vm80_vm0, %v53_v28 }
  0x3a   :  { %1991 = vmatmul.mubr.msk.f32.gmra.mxu0 %vm80_vm0, %v54_v29 }
  0x3b   :  { %1993 = vmatprep.mubr.msk.f32.mxu0 %vm80_vm0, %v55_v30 }
  0x3e   :  { %1994 = vmatmul.mubr.msk.f32.gmra.mxu0 %vm80_vm0, %v56_v31 }
  0x3f   :  { %1996 = vmatprep.mubr.msk.f32.mxu0 %vm80_vm0, %v57_v32 }
  0x42   :  { %1997 = vmatmul.mubr.msk.f32.gmra.mxu0 %vm80_vm0, %v58_v33 }
  0x43   :  { %1999 = vmatprep.mubr.msk.f32.mxu0 %vm80_vm0, %v59_v34 }
  0x46   :  { %2000 = vmatmul.mubr.msk.f32.gmra.mxu0 %vm80_vm0, %v60_v35 }
  0x47   :  { %2002 = vmatprep.mubr.msk.f32.mxu0 %vm80_vm0, %v61_v36 }
  0x4a   :  { %2003 = vmatmul.mubr.msk.f32.gmra.mxu0 %vm80_vm0, %v62_v37 }
  0x4b   :  { %2005 = vmatprep.mubr.msk.f32.mxu0 %vm80_vm0, %v63_v38 }
  0x4e   :  { %2006 = vmatmul.mubr.msk.f32.gmra.mxu0 %vm80_vm0, %v64_v39 }
  0xd2   :  { %v1962_v46 = vpop.f32.mrf.mxu0 }
  0xd3   :  { %v249_v47 = vadd.f32 %v1962_v46, %v2506_v45 }
  0xd4   :  { %v243_v48 = vpop.f32.mrf.mxu0 }
  0xd5   :  { %v244_v49 = vadd.f32 %v2506_v45, %v243_v48  ;;  %v403_v53 = vmax.f32 %v249_v47, 0.0 }
  0xd6   :  { %v1965_v50 = vpop.f32.mrf.mxu0 }
  0xd7   :  { %v402_v51 = vmax.f32 %v244_v49, 0.0  ;;  %v259_v52 = vadd.f32 %v1965_v50, %v2506_v45 }
  0xd8   :  { %v253_v54 = vpop.f32.mrf.mxu0 }
  0xd9   :  { %v254_v56 = vadd.f32 %v2506_v45, %v253_v54  ;;  %2016 = vmatprep.mubr.msk.f32.mxu1 %vm445_vm1, %v402_v51  ;;  %v405_v58 = vmax.f32 %v259_v52, 0.0 }
  0xda   :  { %2017 = vmatmul.mubr.msk.f32.vlgmr.msra.gmra.mxu1 %vm445_vm1, %v403_v53  ;;  %v1968_v59 = vpop.f32.mrf.mxu0 }
  0xdb   :  { %v404_v61 = vmax.f32 %v254_v56, 0.0  ;;  %v269_v62 = vadd.f32 %v1968_v59, %v2506_v45  ;;  %941 = vmatpush1.msra.mxu1 %v801_v55 }
  0xdc   :  { %v263_v63 = vpop.f32.mrf.mxu0  ;;  %942 = vmatprep.subr.mxu1 %v800_v57 }
  0xdd   :  { %2019 = vmatprep.mubr.msk.f32.mxu1 %vm445_vm1, %v404_v61  ;;  %v264_v0 = vadd.f32 %v2506_v45, %v263_v63  ;;  %943 = vmatpush1.msra.mxu1 %v799_v60  ;;  %v407_v1 = vmax.f32 %v269_v62, 0.0 }
  0xde   :  { %2020 = vmatmul.mubr.msk.f32.gmra.mxu1 %vm445_vm1, %v405_v58  ;;  %v1971_v2 = vpop.f32.mrf.mxu0 }
  0xdf   :  { %v406_v3 = vmax.f32 %v264_v0, 0.0  ;;  %v279_v4 = vadd.f32 %v1971_v2, %v2506_v45 }
  0xe0   :  { %v273_v5 = vpop.f32.mrf.mxu0 }
  0xe1   :  { %2022 = vmatprep.mubr.msk.f32.mxu1 %vm445_vm1, %v406_v3  ;;  %v274_v6 = vadd.f32 %v2506_v45, %v273_v5  ;;  %v409_v7 = vmax.f32 %v279_v4, 0.0 }
  0xe2   :  { %2023 = vmatmul.mubr.msk.f32.gmra.mxu1 %vm445_vm1, %v407_v1  ;;  %v1974_v8 = vpop.f32.mrf.mxu0 }
  0xe3   :  { %v408_v9 = vmax.f32 %v274_v6, 0.0  ;;  %v289_v10 = vadd.f32 %v1974_v8, %v2506_v45 }
  0xe4   :  { %v283_v11 = vpop.f32.mrf.mxu0 }
  0xe5   :  { %2025 = vmatprep.mubr.msk.f32.mxu1 %vm445_vm1, %v408_v9  ;;  %v284_v12 = vadd.f32 %v2506_v45, %v283_v11  ;;  %v411_v13 = vmax.f32 %v289_v10, 0.0 }
  0xe6   :  { %2026 = vmatmul.mubr.msk.f32.gmra.mxu1 %vm445_vm1, %v409_v7  ;;  %v1977_v14 = vpop.f32.mrf.mxu0 }
  0xe7   :  { %v410_v15 = vmax.f32 %v284_v12, 0.0  ;;  %v299_v16 = vadd.f32 %v1977_v14, %v2506_v45 }
  0xe8   :  { %v293_v17 = vpop.f32.mrf.mxu0 }
  0xe9   :  { %2028 = vmatprep.mubr.msk.f32.mxu1 %vm445_vm1, %v410_v15  ;;  %v294_v18 = vadd.f32 %v2506_v45, %v293_v17  ;;  %v413_v19 = vmax.f32 %v299_v16, 0.0 }
  0xea   :  { %2029 = vmatmul.mubr.msk.f32.gmra.mxu1 %vm445_vm1, %v411_v13  ;;  %v1980_v20 = vpop.f32.mrf.mxu0 }
  0xeb   :  { %v412_v21 = vmax.f32 %v294_v18, 0.0  ;;  %v309_v22 = vadd.f32 %v1980_v20, %v2506_v45  ;;  %v2282_v18 = vmov 0.0  }
  0xec   :  { %v303_v23 = vpop.f32.mrf.mxu0  ;;  %1272 = vmatprep.subr.mxu0 %v2282_v18  ;;  %2064 = vmatprep.subr.mxu1 %v2282_v18 }
  0xed   :  { %2031 = vmatprep.mubr.msk.f32.mxu1 %vm445_vm1, %v412_v21  ;;  %v304_v24 = vadd.f32 %v2506_v45, %v303_v23  ;;  %v415_v25 = vmax.f32 %v309_v22, 0.0  ;;  %v1248_v22 = vld [vmem:[%s3048_s7 + $0x78] sm:$0xff]  ;;  %v1247_v23 = vld [vmem:[%s3048_s7 + $0x70] sm:$0xff] }
  0xee   :  { %2032 = vmatmul.mubr.msk.f32.gmra.mxu1 %vm445_vm1, %v413_v19  ;;  %v1983_v26 = vpop.f32.mrf.mxu0  ;;  %1273 = vmatpush1.msra.mxu0 %v1248_v22 }
  0xef   :  { %v414_v27 = vmax.f32 %v304_v24, 0.0  ;;  %v319_v28 = vadd.f32 %v1983_v26, %v2506_v45  ;;  %1274 = vmatprep.subr.mxu0 %v2282_v18 }
  0xf0   :  { %v313_v29 = vpop.f32.mrf.mxu0  ;;  %1275 = vmatpush1.msra.mxu0 %v1247_v23 }
  0xf1   :  { %2034 = vmatprep.mubr.msk.f32.mxu1 %vm445_vm1, %v414_v27  ;;  %v314_v30 = vadd.f32 %v2506_v45, %v313_v29  ;;  %v417_v31 = vmax.f32 %v319_v28, 0.0  ;;  %v1246_v27 = vld [vmem:[%s3048_s7 + $0x68] sm:$0xff]  ;;  %1276 = vmatprep.subr.mxu0 %v2282_v18  ;;  %v1245_v29 = vld [vmem:[%s3048_s7 + $0x60] sm:$0xff] }
  0xf2   :  { %2035 = vmatmul.mubr.msk.f32.gmra.mxu1 %vm445_vm1, %v415_v25  ;;  %v1986_v32 = vpop.f32.mrf.mxu0  ;;  %1277 = vmatpush1.msra.mxu0 %v1246_v27 }
  0xf3   :  { %v416_v33 = vmax.f32 %v314_v30, 0.0  ;;  %v329_v34 = vadd.f32 %v1986_v32, %v2506_v45  ;;  %1278 = vmatprep.subr.mxu0 %v2282_v18  ;;  %v1244_v32 = vld [vmem:[%s3048_s7 + $0x58] sm:$0xff] }
  0xf4   :  { %v323_v35 = vpop.f32.mrf.mxu0  ;;  %1279 = vmatpush1.msra.mxu0 %v1245_v29 }
  0xf5   :  { %2037 = vmatprep.mubr.msk.f32.mxu1 %vm445_vm1, %v416_v33  ;;  %v324_v36 = vadd.f32 %v2506_v45, %v323_v35  ;;  %v419_v37 = vmax.f32 %v329_v34, 0.0  ;;  %1280 = vmatprep.subr.mxu0 %v2282_v18  ;;  %v1243_v34 = vld [vmem:[%s3048_s7 + $0x50] sm:$0xff] }
  0xf6   :  { %2038 = vmatmul.mubr.msk.f32.gmra.mxu1 %vm445_vm1, %v417_v31  ;;  %v1989_v38 = vpop.f32.mrf.mxu0  ;;  %1281 = vmatpush1.msra.mxu0 %v1244_v32 }
  0xf7   :  { %v418_v39 = vmax.f32 %v324_v36, 0.0  ;;  %v339_v40 = vadd.f32 %v1989_v38, %v2506_v45  ;;  %1282 = vmatprep.subr.mxu0 %v2282_v18 }
  0xf8   :  { %v333_v41 = vpop.f32.mrf.mxu0  ;;  %1283 = vmatpush1.msra.mxu0 %v1243_v34 }
  0xf9   :  { %2040 = vmatprep.mubr.msk.f32.mxu1 %vm445_vm1, %v418_v39  ;;  %v334_v42 = vadd.f32 %v2506_v45, %v333_v41  ;;  %v421_v43 = vmax.f32 %v339_v40, 0.0  ;;  %1284 = vmatprep.subr.mxu0 %v2282_v18  ;;  %v2632_v39 = vld [vmem:[%s3048_s7 + $0x40] sm:$0xff] }
  0xfa   :  { %2041 = vmatmul.mubr.msk.f32.gmra.mxu1 %vm445_vm1, %v419_v37  ;;  %v1992_v44 = vpop.f32.mrf.mxu0  ;;  %v2624_v37 = vld [vmem:[%s3048_s7 + $0x48] sm:$0xff] }
  0xfb   :  { %v420_v46 = vmax.f32 %v334_v42, 0.0  ;;  %v349_v47 = vadd.f32 %v1992_v44, %v2506_v45  ;;  %1285 = vmatpush1.msra.mxu0 %v2624_v37  ;;  %v2641_v42 = vld [vmem:[%s3048_s7 + $0x38] sm:$0xff]  ;;  %v2650_v44 = vld [vmem:[%s3048_s7 + $0x30] sm:$0xff] }
  0xfc   :  { %v343_v48 = vpop.f32.mrf.mxu0  ;;  %1286 = vmatprep.subr.mxu0 %v2282_v18 }
  0xfd   :  { %2043 = vmatprep.mubr.msk.f32.mxu1 %vm445_vm1, %v420_v46  ;;  %v344_v49 = vadd.f32 %v2506_v45, %v343_v48  ;;  %v423_v50 = vmax.f32 %v349_v47, 0.0  ;;  %1287 = vmatpush1.msra.mxu0 %v2632_v39  ;;  %v2659_v48 = vld [vmem:[%s3048_s7 + $0x28] sm:$0xff] }
  0xfe   :  { %2044 = vmatmul.mubr.msk.f32.gmra.mxu1 %vm445_vm1, %v421_v43  ;;  %v1995_v51 = vpop.f32.mrf.mxu0  ;;  %1288 = vmatprep.subr.mxu0 %v2282_v18 }
  0xff   :  { %v422_v52 = vmax.f32 %v344_v49, 0.0  ;;  %v359_v53 = vadd.f32 %v1995_v51, %v2506_v45  ;;  %1289 = vmatpush1.msra.mxu0 %v2641_v42 }
 0x100   :  { %v353_v54 = vpop.f32.mrf.mxu0  ;;  %1290 = vmatprep.subr.mxu0 %v2282_v18 }
 0x101   :  { %2046 = vmatprep.mubr.msk.f32.mxu1 %vm445_vm1, %v422_v52  ;;  %v354_v55 = vadd.f32 %v2506_v45, %v353_v54  ;;  %v425_v56 = vmax.f32 %v359_v53, 0.0  ;;  %1291 = vmatpush1.msra.mxu0 %v2650_v44  ;;  %v2677_v53 = vld [vmem:[%s3048_s7 + $0x18] sm:$0xff] }
 0x102   :  { %2047 = vmatmul.mubr.msk.f32.gmra.mxu1 %vm445_vm1, %v423_v50  ;;  %v1998_v57 = vpop.f32.mrf.mxu0  ;;  %1292 = vmatprep.subr.mxu0 %v2282_v18  ;;  %v2668_v50 = vld [vmem:[%s3048_s7 + $0x20] sm:$0xff] }
 0x103   :  { %v424_v58 = vmax.f32 %v354_v55, 0.0  ;;  %v369_v59 = vadd.f32 %v1998_v57, %v2506_v45  ;;  %1293 = vmatpush1.msra.mxu0 %v2659_v48  ;;  %v2686_v55 = vld [vmem:[%s3048_s7 + $0x10] sm:$0xff] }
 0x104   :  { %v363_v60 = vpop.f32.mrf.mxu0  ;;  %1294 = vmatprep.subr.mxu0 %v2282_v18 }
 0x105   :  { %2049 = vmatprep.mubr.msk.f32.mxu1 %vm445_vm1, %v424_v58  ;;  %v364_v61 = vadd.f32 %v2506_v45, %v363_v60  ;;  %v427_v62 = vmax.f32 %v369_v59, 0.0  ;;  %1295 = vmatpush1.msra.mxu0 %v2668_v50  ;;  %v2695_v58 = vld [vmem:[%s3048_s7 + $0x8] sm:$0xff]  ;;  %v2704_v60 = vld [vmem:[%s3048_s7] sm:$0xff] }
 0x106   :  { %2050 = vmatmul.mubr.msk.f32.gmra.mxu1 %vm445_vm1, %v425_v56  ;;  %v2001_v63 = vpop.f32.mrf.mxu0  ;;  %1296 = vmatprep.subr.mxu0 %v2282_v18 }
 0x107   :  { %v426_v0 = vmax.f32 %v364_v61, 0.0  ;;  %v379_v1 = vadd.f32 %v2001_v63, %v2506_v45  ;;  %1297 = vmatpush1.msra.mxu0 %v2677_v53  ;;  %v2713_v63 = vld [vmem:[%s3048_s7 + $0xf8] sm:$0xff] }
 0x108   :  { %v373_v2 = vpop.f32.mrf.mxu0  ;;  %1298 = vmatprep.subr.mxu0 %v2282_v18 }
 0x109   :  { %2052 = vmatprep.mubr.msk.f32.mxu1 %vm445_vm1, %v426_v0  ;;  %v374_v3 = vadd.f32 %v2506_v45, %v373_v2  ;;  %v429_v4 = vmax.f32 %v379_v1, 0.0  ;;  %1299 = vmatpush1.msra.mxu0 %v2686_v55  ;;  %v2723_v1 = vld [vmem:[%s3048_s7 + $0xf0] sm:$0xff] }
 0x10a   :  { %2053 = vmatmul.mubr.msk.f32.gmra.mxu1 %vm445_vm1, %v427_v62  ;;  %v2004_v5 = vpop.f32.mrf.mxu0  ;;  %1300 = vmatprep.subr.mxu0 %v2282_v18 }
 0x10b   :  { %v428_v6 = vmax.f32 %v374_v3, 0.0  ;;  %v389_v7 = vadd.f32 %v2004_v5, %v2506_v45  ;;  %1301 = vmatpush1.msra.mxu0 %v2695_v58 }
 0x10c   :  { %v383_v8 = vpop.f32.mrf.mxu0  ;;  %1302 = vmatprep.subr.mxu0 %v2282_v18 }
 0x10d   :  { %2055 = vmatprep.mubr.msk.f32.mxu1 %vm445_vm1, %v428_v6  ;;  %v384_v9 = vadd.f32 %v2506_v45, %v383_v8  ;;  %v431_v10 = vmax.f32 %v389_v7, 0.0  ;;  %1303 = vmatpush1.msra.mxu0 %v2704_v60  ;;  %v2742_v6 = vld [vmem:[%s3048_s7 + $0xe0] sm:$0xff] }
 0x10e   :  { %2056 = vmatmul.mubr.msk.f32.gmra.mxu1 %vm445_vm1, %v429_v4  ;;  %v2007_v11 = vpop.f32.mrf.mxu0  ;;  %1304 = vmatprep.subr.mxu0 %v2282_v18  ;;  %v2732_v4 = vld [vmem:[%s3048_s7 + $0xe8] sm:$0xff] }
 0x10f   :  { %v430_v12 = vmax.f32 %v384_v9, 0.0  ;;  %v399_v13 = vadd.f32 %v2007_v11, %v2506_v45  ;;  %1305 = vmatpush2.msra.mxu0 %v2713_v63  ;;  %v2751_v9 = vld [vmem:[%s3048_s7 + $0xd8] sm:$0xff]  ;;  %v2761_v11 = vld [vmem:[%s3048_s7 + $0xd0] sm:$0xff] }
 0x110   :  { %v393_v14 = vpop.f32.mrf.mxu0  ;;  %1306 = vmatprep.subr.mxu0 %v2282_v18 }
 0x111   :  { %2058 = vmatprep.mubr.msk.f32.mxu1 %vm445_vm1, %v430_v12  ;;  %v394_v15 = vadd.f32 %v2506_v45, %v393_v14  ;;  %v433_v16 = vmax.f32 %v399_v13, 0.0  ;;  %v2587_v45 = vld [vmem:[%s3045_s4] ss:$0 sm:$0xff]  ;;  %1307 = vmatpush2.msra.mxu0 %v2723_v1  ;;  %v2770_v14 = vld [vmem:[%s3048_s7 + $0xc8] sm:$0xff] }
 0x112   :  { %2059 = vmatmul.mubr.msk.f32.gmra.mxu1 %vm445_vm1, %v431_v10  ;;  %1308 = vmatprep.subr.mxu0 %v2282_v18 }
 0x113   :  { %v432_v17 = vmax.f32 %v394_v15, 0.0  ;;  %1309 = vmatpush2.msra.mxu0 %v2732_v4 }
 0x114   :  { %1310 = vmatprep.subr.mxu0 %v2282_v18 }
 0x115   :  { %2061 = vmatprep.mubr.msk.f32.mxu1 %vm445_vm1, %v432_v17  ;;  %1311 = vmatpush2.msra.mxu0 %v2742_v6 }
 0x116   :  { %2062 = vmatmul.mubr.msk.f32.gmra.mxu1 %vm445_vm1, %v433_v16  ;;  %1312 = vmatprep.subr.mxu0 %v2282_v18  ;;  %v2780_v16 = vld [vmem:[%s3048_s7 + $0xc0] sm:$0xff] }
 0x117   :  { %976 = vmatprep.mubr.f32.mxu1 %v2282_v18  ;;  %1313 = vmatpush2.msra.mxu0 %v2751_v9 }
 0x118   :  { %1314 = vmatprep.subr.mxu0 %v2282_v18 }
 0x119   :  { %1315 = vmatpush2.msra.mxu0 %v2761_v11 }
 0x11a   :  { %1316 = vmatprep.subr.mxu0 %v2282_v18 }
 0x11b   :  { %1317 = vmatpush2.msra.mxu0 %v2770_v14 }
 0x11c   :  { %1318 = vmatprep.subr.mxu0 %v2282_v18 }
 0x11d   :  { %1319 = vmatpush2.msra.mxu0 %v2780_v16 }
 0x11e   :  { %1320 = vmatprep.subr.mxu0 %v2282_v18 }
 0x19a   :  { %v2018_v19 = vpop.f32.mrf.mxu1 }
 0x19b   :  { %v614_v25 = vadd.f32 %v2018_v19, %v2587_v45 }
 0x19c   :  { %v608_v20 = vpop.f32.mrf.mxu1 }
 0x19d   :  { %v609_v21 = vadd.f32 %v2587_v45, %v608_v20  ;;  %v768_v30 = vmax.f32 %v614_v25, 0.0  ;;  %v2789_v20 = vld [vmem:[%s3048_s7 + $0xb8] sm:$0xff]  ;;  %v2808_v25 = vld [vmem:[%s3048_s7 + $0xa8] sm:$0xff] }
 0x19e   :  { %v2021_v24 = vpop.f32.mrf.mxu1  ;;  %1321 = vmatpush2.msra.mxu0 %v2789_v20 }
 0x19f   :  { %v767_v26 = vmax.f32 %v609_v21, 0.0  ;;  %v624_v35 = vadd.f32 %v2021_v24, %v2587_v45  ;;  %1322 = vmatprep.subr.mxu0 %v2282_v18 }
 0x1a0   :  { %v618_v28 = vpop.f32.mrf.mxu1 }
 0x1a1   :  { %1803 = vmatmul.mubr.msk.f32.vlgmr.msra.gmra.mxu1 %vm815_vm2, %v767_v26  ;;  %v619_v31 = vadd.f32 %v2587_v45, %v618_v28  ;;  %v770_v40 = vmax.f32 %v624_v35, 0.0 }
 0x1a2   :  { %982 = vmatprep.mubr.f32.mxu1 %v2282_v18  ;;  %2096 = vmatpush1.msra.mxu1 %v1248_v22  ;;  %v2024_v33 = vpop.f32.mrf.mxu1  ;;  %v2799_v22 = vld [vmem:[%s3048_s7 + $0xb0] sm:$0xff] }
 0x1a3   :  { %2065 = vmatprep.subr.mxu1 %v2282_v18  ;;  %v769_v36 = vmax.f32 %v619_v31, 0.0  ;;  %v634_v46 = vadd.f32 %v2024_v33, %v2587_v45  ;;  %1323 = vmatpush2.msra.mxu0 %v2799_v22 }
 0x1a4   :  { %2097 = vmatpush1.msra.mxu1 %v1247_v23  ;;  %v628_v38 = vpop.f32.mrf.mxu1  ;;  %1324 = vmatprep.subr.mxu0 %v2282_v18 }
 0x1a5   :  { %1804 = vmatmul.mubr.msk.f32.gmra.mxu1 %vm815_vm2, %v768_v30  ;;  %2066 = vmatprep.subr.mxu1 %v2282_v18  ;;  %v629_v41 = vadd.f32 %v2587_v45, %v628_v38  ;;  %v772_v51 = vmax.f32 %v634_v46, 0.0  ;;  %v1250_v46 = vld [vmem:[%s3048_s7 + $0x88] sm:$0xff] }
 0x1a6   :  { %988 = vmatprep.mubr.f32.mxu1 %v2282_v18  ;;  %2098 = vmatpush1.msra.mxu1 %v1246_v27  ;;  %v2027_v43 = vpop.f32.mrf.mxu1  ;;  %v2818_v27 = vld [vmem:[%s3048_s7 + $0xa0] sm:$0xff] }
 0x1a7   :  { %2067 = vmatprep.subr.mxu1 %v2282_v18  ;;  %v771_v47 = vmax.f32 %v629_v41, 0.0  ;;  %v644_v56 = vadd.f32 %v2027_v43, %v2587_v45  ;;  %1325 = vmatpush2.msra.mxu0 %v2808_v25  ;;  %v1251_v43 = vld [vmem:[%s3048_s7 + $0x90] sm:$0xff] }
 0x1a8   :  { %2099 = vmatpush1.msra.mxu1 %v1245_v29  ;;  %v638_v49 = vpop.f32.mrf.mxu1  ;;  %1326 = vmatprep.subr.mxu0 %v2282_v18 }
 0x1a9   :  { %1805 = vmatmul.mubr.msk.f32.gmra.mxu1 %vm815_vm2, %v769_v36  ;;  %2068 = vmatprep.subr.mxu1 %v2282_v18  ;;  %v639_v52 = vadd.f32 %v2587_v45, %v638_v49  ;;  %v774_v61 = vmax.f32 %v644_v56, 0.0  ;;  %v1249_v49 = vld [vmem:[%s3048_s7 + $0x80] sm:$0xff] }
 0x1aa   :  { %994 = vmatprep.mubr.f32.mxu1 %v2282_v18  ;;  %2100 = vmatpush1.msra.mxu1 %v1244_v32  ;;  %v2030_v54 = vpop.f32.mrf.mxu1 }
 0x1ab   :  { %2069 = vmatprep.subr.mxu1 %v2282_v18  ;;  %v773_v57 = vmax.f32 %v639_v52, 0.0  ;;  %v654_v2 = vadd.f32 %v2030_v54, %v2587_v45  ;;  %1327 = vmatpush2.msra.mxu0 %v2818_v27 }
 0x1ac   :  { %2101 = vmatpush1.msra.mxu1 %v1243_v34  ;;  %v648_v59 = vpop.f32.mrf.mxu1  ;;  %1328 = vmatprep.subr.mxu0 %v2282_v18 }
 0x1ad   :  { %1806 = vmatmul.mubr.msk.f32.gmra.mxu1 %vm815_vm2, %v770_v40  ;;  %2070 = vmatprep.subr.mxu1 %v2282_v18  ;;  %v649_v62 = vadd.f32 %v2587_v45, %v648_v59  ;;  %v776_v7 = vmax.f32 %v654_v2, 0.0  ;;  %v1252_v40 = vld [vmem:[%s3048_s7 + $0x98] sm:$0xff] }
 0x1ae   :  { %1000 = vmatprep.mubr.f32.mxu1 %v2282_v18  ;;  %2102 = vmatpush1.msra.mxu1 %v2624_v37  ;;  %v2033_v0 = vpop.f32.mrf.mxu1 }
 0x1af   :  { %2071 = vmatprep.subr.mxu1 %v2282_v18  ;;  %v775_v3 = vmax.f32 %v649_v62, 0.0  ;;  %v664_v12 = vadd.f32 %v2033_v0, %v2587_v45  ;;  %1329 = vmatpush2.msra.mxu0 %v1252_v40 }
 0x1b0   :  { %2103 = vmatpush1.msra.mxu1 %v2632_v39  ;;  %v658_v5 = vpop.f32.mrf.mxu1  ;;  %1330 = vmatprep.subr.mxu0 %v2282_v18 }
 0x1b1   :  { %1807 = vmatmul.mubr.msk.f32.gmra.mxu1 %vm815_vm2, %v771_v47  ;;  %2072 = vmatprep.subr.mxu1 %v2282_v18  ;;  %v659_v8 = vadd.f32 %v2587_v45, %v658_v5  ;;  %v778_v17 = vmax.f32 %v664_v12, 0.0 }
 0x1b2   :  { %1006 = vmatprep.mubr.f32.mxu1 %v2282_v18  ;;  %2104 = vmatpush1.msra.mxu1 %v2641_v42  ;;  %v2036_v10 = vpop.f32.mrf.mxu1 }
 0x1b3   :  { %2073 = vmatprep.subr.mxu1 %v2282_v18  ;;  %v777_v13 = vmax.f32 %v659_v8, 0.0  ;;  %v674_v23 = vadd.f32 %v2036_v10, %v2587_v45  ;;  %1331 = vmatpush2.msra.mxu0 %v1251_v43 }
 0x1b4   :  { %2105 = vmatpush1.msra.mxu1 %v2650_v44  ;;  %v668_v15 = vpop.f32.mrf.mxu1  ;;  %1332 = vmatprep.subr.mxu0 %v2282_v18 }
 0x1b5   :  { %1808 = vmatmul.mubr.msk.f32.gmra.mxu1 %vm815_vm2, %v772_v51  ;;  %2074 = vmatprep.subr.mxu1 %v2282_v18  ;;  %v669_v19 = vadd.f32 %v2587_v45, %v668_v15  ;;  %v780_v28 = vmax.f32 %v674_v23, 0.0  ;;  %v805_v23 = vlaneseq }
 0x1b6   :  { %1012 = vmatprep.mubr.f32.mxu1 %v2282_v18  ;;  %2106 = vmatpush1.msra.mxu1 %v2659_v48  ;;  %v2039_v21 = vpop.f32.mrf.mxu1 }
 0x1b7   :  { %2075 = vmatprep.subr.mxu1 %v2282_v18  ;;  %v779_v24 = vmax.f32 %v669_v19, 0.0  ;;  %v684_v31 = vadd.f32 %v2039_v21, %v2587_v45  ;;  %1333 = vmatpush2.msra.mxu0 %v1250_v46 }
 0x1b8   :  { %2107 = vmatpush1.msra.mxu1 %v2668_v50  ;;  %v678_v26 = vpop.f32.mrf.mxu1  ;;  %1334 = vmatprep.subr.mxu0 %v2282_v18 }
 0x1b9   :  { %1809 = vmatmul.mubr.msk.f32.gmra.mxu1 %vm815_vm2, %v773_v57  ;;  %2076 = vmatprep.subr.mxu1 %v2282_v18  ;;  %v679_v29 = vadd.f32 %v2587_v45, %v678_v26  ;;  %v782_v34 = vmax.f32 %v684_v31, 0.0  ;;  %v803_v26 = vld [vmem:[%s3047_s6] sm:$0x3] }
 0x1ba   :  { %1018 = vmatprep.mubr.f32.mxu1 %v2282_v18  ;;  %2108 = vmatpush1.msra.mxu1 %v2677_v53  ;;  %v2042_v30 = vpop.f32.mrf.mxu1 }
 0x1bb   :  { %2077 = vmatprep.subr.mxu1 %v2282_v18  ;;  %v781_v32 = vmax.f32 %v679_v29, 0.0  ;;  %v694_v37 = vadd.f32 %v2042_v30, %v2587_v45  ;;  %1335 = vmatpush2.msra.mxu0 %v1249_v49 }
 0x1bc   :  { %2109 = vmatpush1.msra.mxu1 %v2686_v55  ;;  %v688_v33 = vpop.f32.mrf.mxu1 }
 0x1bd   :  { %1810 = vmatmul.mubr.msk.f32.gmra.mxu1 %vm815_vm2, %v774_v61  ;;  %2078 = vmatprep.subr.mxu1 %v2282_v18  ;;  %v689_v35 = vadd.f32 %v2587_v45, %v688_v33  ;;  %v784_v41 = vmax.f32 %v694_v37, 0.0 }
 0x1be   :  { %1024 = vmatprep.mubr.f32.mxu1 %v2282_v18  ;;  %2110 = vmatpush1.msra.mxu1 %v2695_v58  ;;  %v2045_v36 = vpop.f32.mrf.mxu1 }
 0x1bf   :  { %2079 = vmatprep.subr.mxu1 %v2282_v18  ;;  %v783_v38 = vmax.f32 %v689_v35, 0.0  ;;  %v704_v47 = vadd.f32 %v2045_v36, %v2587_v45 }
 0x1c0   :  { %2111 = vmatpush1.msra.mxu1 %v2704_v60  ;;  %v698_v39 = vpop.f32.mrf.mxu1 }
 0x1c1   :  { %1811 = vmatmul.mubr.msk.f32.gmra.mxu1 %vm815_vm2, %v775_v3  ;;  %2080 = vmatprep.subr.mxu1 %v2282_v18  ;;  %v699_v42 = vadd.f32 %v2587_v45, %v698_v39  ;;  %v786_v51 = vmax.f32 %v704_v47, 0.0 }
 0x1c2   :  { %1030 = vmatprep.mubr.f32.mxu1 %v2282_v18  ;;  %2112 = vmatpush2.msra.mxu1 %v2713_v63  ;;  %v2048_v44 = vpop.f32.mrf.mxu1 }
 0x1c3   :  { %2081 = vmatprep.subr.mxu1 %v2282_v18  ;;  %v785_v48 = vmax.f32 %v699_v42, 0.0  ;;  %v714_v54 = vadd.f32 %v2048_v44, %v2587_v45 }
 0x1c4   :  { %2113 = vmatpush2.msra.mxu1 %v2723_v1  ;;  %v708_v50 = vpop.f32.mrf.mxu1 }
 0x1c5   :  { %1812 = vmatmul.mubr.msk.f32.gmra.mxu1 %vm815_vm2, %v776_v7  ;;  %2082 = vmatprep.subr.mxu1 %v2282_v18  ;;  %v709_v52 = vadd.f32 %v2587_v45, %v708_v50  ;;  %v788_v57 = vmax.f32 %v714_v54, 0.0 }
 0x1c6   :  { %1036 = vmatprep.mubr.f32.mxu1 %v2282_v18  ;;  %2114 = vmatpush2.msra.mxu1 %v2732_v4  ;;  %v2051_v53 = vpop.f32.mrf.mxu1 }
 0x1c7   :  { %2083 = vmatprep.subr.mxu1 %v2282_v18  ;;  %v787_v55 = vmax.f32 %v709_v52, 0.0  ;;  %v724_v60 = vadd.f32 %v2051_v53, %v2587_v45 }
 0x1c8   :  { %2115 = vmatpush2.msra.mxu1 %v2742_v6  ;;  %v718_v56 = vpop.f32.mrf.mxu1 }
 0x1c9   :  { %1813 = vmatmul.mubr.msk.f32.gmra.mxu1 %vm815_vm2, %v777_v13  ;;  %2084 = vmatprep.subr.mxu1 %v2282_v18  ;;  %v719_v58 = vadd.f32 %v2587_v45, %v718_v56  ;;  %v790_v63 = vmax.f32 %v724_v60, 0.0 }
 0x1ca   :  { %1042 = vmatprep.mubr.f32.mxu1 %v2282_v18  ;;  %2116 = vmatpush2.msra.mxu1 %v2751_v9  ;;  %v2054_v59 = vpop.f32.mrf.mxu1 }
 0x1cb   :  { %2085 = vmatprep.subr.mxu1 %v2282_v18  ;;  %v789_v61 = vmax.f32 %v719_v58, 0.0  ;;  %v734_v2 = vadd.f32 %v2054_v59, %v2587_v45 }
 0x1cc   :  { %2117 = vmatpush2.msra.mxu1 %v2761_v11  ;;  %v728_v62 = vpop.f32.mrf.mxu1 }
 0x1cd   :  { %1814 = vmatmul.mubr.msk.f32.gmra.mxu1 %vm815_vm2, %v778_v17  ;;  %2086 = vmatprep.subr.mxu1 %v2282_v18  ;;  %v729_v0 = vadd.f32 %v2587_v45, %v728_v62  ;;  %v792_v5 = vmax.f32 %v734_v2, 0.0 }
 0x1ce   :  { %1048 = vmatprep.mubr.f32.mxu1 %v2282_v18  ;;  %2118 = vmatpush2.msra.mxu1 %v2770_v14  ;;  %v2057_v1 = vpop.f32.mrf.mxu1 }
 0x1cf   :  { %2087 = vmatprep.subr.mxu1 %v2282_v18  ;;  %v791_v3 = vmax.f32 %v729_v0, 0.0  ;;  %v744_v8 = vadd.f32 %v2057_v1, %v2587_v45 }
 0x1d0   :  { %2119 = vmatpush2.msra.mxu1 %v2780_v16  ;;  %v738_v4 = vpop.f32.mrf.mxu1 }
 0x1d1   :  { %1815 = vmatmul.mubr.msk.f32.gmra.mxu1 %vm815_vm2, %v779_v24  ;;  %2088 = vmatprep.subr.mxu1 %v2282_v18  ;;  %v739_v6 = vadd.f32 %v2587_v45, %v738_v4  ;;  %v794_v11 = vmax.f32 %v744_v8, 0.0  ;;  %v806_v24 = vshrl.u32 %v805_v23, 7 }
 0x1d2   :  { %1054 = vmatprep.mubr.f32.mxu1 %v2282_v18  ;;  %2120 = vmatpush2.msra.mxu1 %v2789_v20  ;;  %v2060_v7 = vpop.f32.mrf.mxu1 }
 0x1d3   :  { %2089 = vmatprep.subr.mxu1 %v2282_v18  ;;  %v793_v9 = vmax.f32 %v739_v6, 0.0  ;;  %v754_v14 = vadd.f32 %v2060_v7, %v2587_v45 }
 0x1d4   :  { %2121 = vmatpush2.msra.mxu1 %v2799_v22  ;;  %v748_v10 = vpop.f32.mrf.mxu1 }
 0x1d5   :  { %1816 = vmatmul.mubr.msk.f32.gmra.mxu1 %vm815_vm2, %v780_v28  ;;  %2090 = vmatprep.subr.mxu1 %v2282_v18  ;;  %v749_v12 = vadd.f32 %v2587_v45, %v748_v10  ;;  %v796_v17 = vmax.f32 %v754_v14, 0.0 }
 0x1d6   :  { %1060 = vmatprep.mubr.f32.mxu1 %v2282_v18  ;;  %2122 = vmatpush2.msra.mxu1 %v2808_v25  ;;  %v2063_v13 = vpop.f32.mrf.mxu1  ;;  %v807_v25 = vsub.s32 0, %v806_v24 }
 0x1d7   :  { %2091 = vmatprep.subr.mxu1 %v2282_v18  ;;  %v795_v15 = vmax.f32 %v749_v12, 0.0  ;;  %v764_v20 = vadd.f32 %v2063_v13, %v2587_v45 }
 0x1d8   :  { %2123 = vmatpush2.msra.mxu1 %v2818_v27  ;;  %v758_v16 = vpop.f32.mrf.mxu1  ;;  %v811_v27 = vsub.s32 1, %v806_v24  ;;  %v2933_v28 = vrot.slane %v803_v26, %v807_v25 }
 0x1d9   :  { %1817 = vmatmul.mubr.msk.f32.gmra.mxu1 %vm815_vm2, %v781_v32  ;;  %2092 = vmatprep.subr.mxu1 %v2282_v18  ;;  %v759_v19 = vadd.f32 %v2587_v45, %v758_v16  ;;  %v798_v22 = vmax.f32 %v764_v20, 0.0 }
 0x1da   :  { %1066 = vmatprep.mubr.f32.mxu1 %v2282_v18  ;;  %2124 = vmatpush2.msra.mxu1 %v1252_v40  ;;  %v2935_v29 = vrot.slane %v803_v26, %v811_v27 }
 0x1db   :  { %2093 = vmatprep.subr.mxu1 %v2282_v18  ;;  %v797_v21 = vmax.f32 %v759_v19, 0.0 }
 0x1dc   :  { %2125 = vmatpush2.msra.mxu1 %v1251_v43 }
 0x1dd   :  { %1818 = vmatmul.mubr.msk.f32.gmra.mxu1 %vm815_vm2, %v782_v34  ;;  %2094 = vmatprep.subr.mxu1 %v2282_v18 }
 0x1de   :  { %1072 = vmatprep.mubr.f32.mxu1 %v2282_v18  ;;  %2126 = vmatpush2.msra.mxu1 %v1250_v46 }
 0x1df   :  { %2095 = vmatprep.subr.mxu1 %v2282_v18 }
 0x1e0   :  { %2127 = vmatpush2.msra.mxu1 %v1249_v49 }
 0x1e1   :  { %1819 = vmatmul.mubr.msk.f32.gmra.mxu1 %vm815_vm2, %v783_v38 }
 0x1e2   :  { %1078 = vmatprep.mubr.f32.mxu1 %v2282_v18 }
 0x1e5   :  { %1820 = vmatmul.mubr.msk.f32.gmra.mxu1 %vm815_vm2, %v784_v41 }
 0x1e6   :  { %1084 = vmatprep.mubr.f32.mxu1 %v2282_v18 }
 0x1e9   :  { %1821 = vmatmul.mubr.msk.f32.gmra.mxu1 %vm815_vm2, %v785_v48 }
 0x1ea   :  { %1090 = vmatprep.mubr.f32.mxu1 %v2282_v18 }
 0x1ed   :  { %1822 = vmatmul.mubr.msk.f32.gmra.mxu1 %vm815_vm2, %v786_v51 }
 0x1ee   :  { %1096 = vmatprep.mubr.f32.mxu1 %v2282_v18 }
 0x1f1   :  { %1823 = vmatmul.mubr.msk.f32.gmra.mxu1 %vm815_vm2, %v787_v55 }
 0x1f2   :  { %1102 = vmatprep.mubr.f32.mxu1 %v2282_v18 }
 0x1f5   :  { %1824 = vmatmul.mubr.msk.f32.gmra.mxu1 %vm815_vm2, %v788_v57 }
 0x1f6   :  { %1108 = vmatprep.mubr.f32.mxu1 %v2282_v18 }
 0x1f9   :  { %1825 = vmatmul.mubr.msk.f32.gmra.mxu1 %vm815_vm2, %v789_v61 }
 0x1fa   :  { %1114 = vmatprep.mubr.f32.mxu1 %v2282_v18 }
 0x1fd   :  { %1826 = vmatmul.mubr.msk.f32.gmra.mxu1 %vm815_vm2, %v790_v63 }
 0x1fe   :  { %1120 = vmatprep.mubr.f32.mxu1 %v2282_v18 }
 0x201   :  { %1827 = vmatmul.mubr.msk.f32.gmra.mxu1 %vm815_vm2, %v791_v3 }
 0x202   :  { %1126 = vmatprep.mubr.f32.mxu1 %v2282_v18 }
 0x205   :  { %1828 = vmatmul.mubr.msk.f32.gmra.mxu1 %vm815_vm2, %v792_v5 }
 0x206   :  { %1132 = vmatprep.mubr.f32.mxu1 %v2282_v18 }
 0x209   :  { %1829 = vmatmul.mubr.msk.f32.gmra.mxu1 %vm815_vm2, %v793_v9 }
 0x20a   :  { %1138 = vmatprep.mubr.f32.mxu1 %v2282_v18 }
 0x20d   :  { %1830 = vmatmul.mubr.msk.f32.gmra.mxu1 %vm815_vm2, %v794_v11 }
 0x20e   :  { %1144 = vmatprep.mubr.f32.mxu1 %v2282_v18 }
 0x211   :  { %1831 = vmatmul.mubr.msk.f32.gmra.mxu1 %vm815_vm2, %v795_v15 }
 0x212   :  { %1150 = vmatprep.mubr.f32.mxu1 %v2282_v18 }
 0x215   :  { %1832 = vmatmul.mubr.msk.f32.gmra.mxu1 %vm815_vm2, %v796_v17 }
 0x216   :  { %1156 = vmatprep.mubr.f32.mxu1 %v2282_v18 }
 0x219   :  { %1833 = vmatmul.mubr.msk.f32.gmra.mxu1 %vm815_vm2, %v797_v21 }
 0x21a   :  { %1162 = vmatprep.mubr.f32.mxu1 %v2282_v18 }
 0x21d   :  { %1834 = vmatmul.mubr.msk.f32.gmra.mxu1 %vm815_vm2, %v798_v22 }
 0x261   :  { %v978_v45 = vpop.f32.mrf.mxu1 }
 0x262   :  { %v979_v30 = vadd.f32 %v978_v45, %v2933_v28 }
 0x263   :  { %v980_v31 = vpop.f32.mrf.mxu1 }
 0x264   :  { %v981_v18 = vadd.f32 %v980_v31, %v2935_v29  ;;  %v1169_v34 = vmax.f32 %v979_v30, 0.0 }
 0x265   :  { %v984_v32 = vpop.f32.mrf.mxu1 }
 0x266   :  { %v1170_v33 = vmax.f32 %v981_v18, 0.0  ;;  %v985_v35 = vadd.f32 %v984_v32, %v2933_v28 }
 0x267   :  { %v986_v36 = vpop.f32.mrf.mxu1 }
 0x268   :  { %v987_v37 = vadd.f32 %v986_v36, %v2935_v29  ;;  %1336 = vmatprep.mubr.f32.mxu0 %v1170_v33  ;;  %v1171_v40 = vmax.f32 %v985_v35, 0.0 }
 0x269   :  { %v990_v38 = vpop.f32.mrf.mxu1  ;;  %1337 = vmatmul.mubr.f32.vlgmr.msra.gmra.mxu0 %v1169_v34 }
 0x26a   :  { %v1172_v39 = vmax.f32 %v987_v37, 0.0  ;;  %v991_v41 = vadd.f32 %v990_v38, %v2933_v28 }
 0x26b   :  { %v992_v42 = vpop.f32.mrf.mxu1 }
 0x26c   :  { %v993_v43 = vadd.f32 %v992_v42, %v2935_v29  ;;  %1341 = vmatprep.mubr.f32.mxu0 %v1172_v39  ;;  %v1173_v47 = vmax.f32 %v991_v41, 0.0 }
 0x26d   :  { %v996_v44 = vpop.f32.mrf.mxu1  ;;  %1342 = vmatmul.mubr.f32.gmra.mxu0 %v1171_v40 }
 0x26e   :  { %v1174_v46 = vmax.f32 %v993_v43, 0.0  ;;  %v997_v48 = vadd.f32 %v996_v44, %v2933_v28 }
 0x26f   :  { %v998_v49 = vpop.f32.mrf.mxu1 }
 0x270   :  { %v999_v50 = vadd.f32 %v998_v49, %v2935_v29  ;;  %1346 = vmatprep.mubr.f32.mxu0 %v1174_v46  ;;  %v1175_v53 = vmax.f32 %v997_v48, 0.0 }
 0x271   :  { %v1002_v51 = vpop.f32.mrf.mxu1  ;;  %1347 = vmatmul.mubr.f32.gmra.mxu0 %v1173_v47 }
 0x272   :  { %v1176_v52 = vmax.f32 %v999_v50, 0.0  ;;  %v1003_v54 = vadd.f32 %v1002_v51, %v2933_v28 }
 0x273   :  { %v1004_v55 = vpop.f32.mrf.mxu1 }
 0x274   :  { %v1005_v56 = vadd.f32 %v1004_v55, %v2935_v29  ;;  %1351 = vmatprep.mubr.f32.mxu0 %v1176_v52  ;;  %v1177_v59 = vmax.f32 %v1003_v54, 0.0 }
 0x275   :  { %v1008_v57 = vpop.f32.mrf.mxu1  ;;  %1352 = vmatmul.mubr.f32.gmra.mxu0 %v1175_v53 }
 0x276   :  { %v1178_v58 = vmax.f32 %v1005_v56, 0.0  ;;  %v1009_v60 = vadd.f32 %v1008_v57, %v2933_v28 }
 0x277   :  { %v1010_v61 = vpop.f32.mrf.mxu1 }
 0x278   :  { %v1011_v62 = vadd.f32 %v1010_v61, %v2935_v29  ;;  %1356 = vmatprep.mubr.f32.mxu0 %v1178_v58  ;;  %v1179_v1 = vmax.f32 %v1009_v60, 0.0 }
 0x279   :  { %v1014_v63 = vpop.f32.mrf.mxu1  ;;  %1357 = vmatmul.mubr.f32.gmra.mxu0 %v1177_v59 }
 0x27a   :  { %v1180_v0 = vmax.f32 %v1011_v62, 0.0  ;;  %v1015_v2 = vadd.f32 %v1014_v63, %v2933_v28 }
 0x27b   :  { %v1016_v3 = vpop.f32.mrf.mxu1 }
 0x27c   :  { %v1017_v4 = vadd.f32 %v1016_v3, %v2935_v29  ;;  %1361 = vmatprep.mubr.f32.mxu0 %v1180_v0  ;;  %v1181_v7 = vmax.f32 %v1015_v2, 0.0 }
 0x27d   :  { %v1020_v5 = vpop.f32.mrf.mxu1  ;;  %1362 = vmatmul.mubr.f32.gmra.mxu0 %v1179_v1 }
 0x27e   :  { %v1182_v6 = vmax.f32 %v1017_v4, 0.0  ;;  %v1021_v8 = vadd.f32 %v1020_v5, %v2933_v28 }
 0x27f   :  { %v1022_v9 = vpop.f32.mrf.mxu1 }
 0x280   :  { %v1023_v10 = vadd.f32 %v1022_v9, %v2935_v29  ;;  %1366 = vmatprep.mubr.f32.mxu0 %v1182_v6  ;;  %v1183_v13 = vmax.f32 %v1021_v8, 0.0 }
 0x281   :  { %v1026_v11 = vpop.f32.mrf.mxu1  ;;  %1367 = vmatmul.mubr.f32.gmra.mxu0 %v1181_v7 }
 0x282   :  { %v1184_v12 = vmax.f32 %v1023_v10, 0.0  ;;  %v1027_v14 = vadd.f32 %v1026_v11, %v2933_v28 }
 0x283   :  { %v1028_v15 = vpop.f32.mrf.mxu1 }
 0x284   :  { %v1029_v16 = vadd.f32 %v1028_v15, %v2935_v29  ;;  %1371 = vmatprep.mubr.f32.mxu0 %v1184_v12  ;;  %v1185_v20 = vmax.f32 %v1027_v14, 0.0 }
 0x285   :  { %v1032_v17 = vpop.f32.mrf.mxu1  ;;  %1372 = vmatmul.mubr.f32.gmra.mxu0 %v1183_v13 }
 0x286   :  { %v1186_v19 = vmax.f32 %v1029_v16, 0.0  ;;  %v1033_v21 = vadd.f32 %v1032_v17, %v2933_v28 }
 0x287   :  { %v1034_v22 = vpop.f32.mrf.mxu1 }
 0x288   :  { %v1035_v23 = vadd.f32 %v1034_v22, %v2935_v29  ;;  %1376 = vmatprep.mubr.f32.mxu0 %v1186_v19  ;;  %v1187_v26 = vmax.f32 %v1033_v21, 0.0 }
 0x289   :  { %v1038_v24 = vpop.f32.mrf.mxu1  ;;  %1377 = vmatmul.mubr.f32.gmra.mxu0 %v1185_v20 }
 0x28a   :  { %v1188_v25 = vmax.f32 %v1035_v23, 0.0  ;;  %v1039_v27 = vadd.f32 %v1038_v24, %v2933_v28 }
 0x28b   :  { %v1040_v45 = vpop.f32.mrf.mxu1 }
 0x28c   :  { %v1041_v30 = vadd.f32 %v1040_v45, %v2935_v29  ;;  %1381 = vmatprep.mubr.f32.mxu0 %v1188_v25  ;;  %v1189_v32 = vmax.f32 %v1039_v27, 0.0 }
 0x28d   :  { %v1044_v31 = vpop.f32.mrf.mxu1  ;;  %1382 = vmatmul.mubr.f32.gmra.mxu0 %v1187_v26 }
 0x28e   :  { %v1190_v18 = vmax.f32 %v1041_v30, 0.0  ;;  %v1045_v33 = vadd.f32 %v1044_v31, %v2933_v28 }
 0x28f   :  { %v1046_v34 = vpop.f32.mrf.mxu1 }
 0x290   :  { %v1047_v35 = vadd.f32 %v1046_v34, %v2935_v29  ;;  %1386 = vmatprep.mubr.f32.mxu0 %v1190_v18  ;;  %v1191_v38 = vmax.f32 %v1045_v33, 0.0 }
 0x291   :  { %v1050_v36 = vpop.f32.mrf.mxu1  ;;  %1387 = vmatmul.mubr.f32.gmra.mxu0 %v1189_v32 }
 0x292   :  { %v1192_v37 = vmax.f32 %v1047_v35, 0.0  ;;  %v1051_v39 = vadd.f32 %v1050_v36, %v2933_v28 }
 0x293   :  { %v1052_v40 = vpop.f32.mrf.mxu1 }
 0x294   :  { %v1053_v41 = vadd.f32 %v1052_v40, %v2935_v29  ;;  %1391 = vmatprep.mubr.f32.mxu0 %v1192_v37  ;;  %v1193_v44 = vmax.f32 %v1051_v39, 0.0 }
 0x295   :  { %v1056_v42 = vpop.f32.mrf.mxu1  ;;  %1392 = vmatmul.mubr.f32.gmra.mxu0 %v1191_v38 }
 0x296   :  { %v1194_v43 = vmax.f32 %v1053_v41, 0.0  ;;  %v1057_v46 = vadd.f32 %v1056_v42, %v2933_v28 }
 0x297   :  { %v1058_v47 = vpop.f32.mrf.mxu1 }
 0x298   :  { %v1059_v48 = vadd.f32 %v1058_v47, %v2935_v29  ;;  %1396 = vmatprep.mubr.f32.mxu0 %v1194_v43  ;;  %v1195_v51 = vmax.f32 %v1057_v46, 0.0 }
 0x299   :  { %v1062_v49 = vpop.f32.mrf.mxu1  ;;  %1397 = vmatmul.mubr.f32.gmra.mxu0 %v1193_v44 }
 0x29a   :  { %v1196_v50 = vmax.f32 %v1059_v48, 0.0  ;;  %v1063_v52 = vadd.f32 %v1062_v49, %v2933_v28 }
 0x29b   :  { %v1064_v53 = vpop.f32.mrf.mxu1 }
 0x29c   :  { %v1065_v54 = vadd.f32 %v1064_v53, %v2935_v29  ;;  %1401 = vmatprep.mubr.f32.mxu0 %v1196_v50  ;;  %v1197_v57 = vmax.f32 %v1063_v52, 0.0 }
 0x29d   :  { %v1068_v55 = vpop.f32.mrf.mxu1  ;;  %1402 = vmatmul.mubr.f32.gmra.mxu0 %v1195_v51 }
 0x29e   :  { %v1198_v56 = vmax.f32 %v1065_v54, 0.0  ;;  %v1069_v58 = vadd.f32 %v1068_v55, %v2933_v28 }
 0x29f   :  { %v1070_v59 = vpop.f32.mrf.mxu1 }
 0x2a0   :  { %v1071_v60 = vadd.f32 %v1070_v59, %v2935_v29  ;;  %1406 = vmatprep.mubr.f32.mxu0 %v1198_v56  ;;  %v1199_v63 = vmax.f32 %v1069_v58, 0.0 }
 0x2a1   :  { %v1074_v61 = vpop.f32.mrf.mxu1  ;;  %1407 = vmatmul.mubr.f32.gmra.mxu0 %v1197_v57 }
 0x2a2   :  { %v1200_v62 = vmax.f32 %v1071_v60, 0.0  ;;  %v1075_v0 = vadd.f32 %v1074_v61, %v2933_v28 }
 0x2a3   :  { %v1076_v1 = vpop.f32.mrf.mxu1 }
 0x2a4   :  { %v1077_v2 = vadd.f32 %v1076_v1, %v2935_v29  ;;  %1411 = vmatprep.mubr.f32.mxu0 %v1200_v62  ;;  %v1201_v5 = vmax.f32 %v1075_v0, 0.0 }
 0x2a5   :  { %v1080_v3 = vpop.f32.mrf.mxu1  ;;  %1412 = vmatmul.mubr.f32.gmra.mxu0 %v1199_v63 }
 0x2a6   :  { %v1202_v4 = vmax.f32 %v1077_v2, 0.0  ;;  %v1081_v6 = vadd.f32 %v1080_v3, %v2933_v28 }
 0x2a7   :  { %v1082_v7 = vpop.f32.mrf.mxu1 }
 0x2a8   :  { %v1083_v8 = vadd.f32 %v1082_v7, %v2935_v29  ;;  %1416 = vmatprep.mubr.f32.mxu0 %v1202_v4  ;;  %v1203_v11 = vmax.f32 %v1081_v6, 0.0 }
 0x2a9   :  { %v1086_v9 = vpop.f32.mrf.mxu1  ;;  %1417 = vmatmul.mubr.f32.gmra.mxu0 %v1201_v5 }
 0x2aa   :  { %v1204_v10 = vmax.f32 %v1083_v8, 0.0  ;;  %v1087_v12 = vadd.f32 %v1086_v9, %v2933_v28 }
 0x2ab   :  { %v1088_v13 = vpop.f32.mrf.mxu1 }
 0x2ac   :  { %v1089_v14 = vadd.f32 %v1088_v13, %v2935_v29  ;;  %1421 = vmatprep.mubr.f32.mxu0 %v1204_v10  ;;  %v1205_v17 = vmax.f32 %v1087_v12, 0.0 }
 0x2ad   :  { %v1092_v15 = vpop.f32.mrf.mxu1  ;;  %1422 = vmatmul.mubr.f32.gmra.mxu0 %v1203_v11 }
 0x2ae   :  { %v1206_v16 = vmax.f32 %v1089_v14, 0.0  ;;  %v1093_v19 = vadd.f32 %v1092_v15, %v2933_v28 }
 0x2af   :  { %v1094_v20 = vpop.f32.mrf.mxu1 }
 0x2b0   :  { %v1095_v21 = vadd.f32 %v1094_v20, %v2935_v29  ;;  %1426 = vmatprep.mubr.f32.mxu0 %v1206_v16  ;;  %v1207_v24 = vmax.f32 %v1093_v19, 0.0 }
 0x2b1   :  { %v1098_v22 = vpop.f32.mrf.mxu1  ;;  %1427 = vmatmul.mubr.f32.gmra.mxu0 %v1205_v17 }
 0x2b2   :  { %v1208_v23 = vmax.f32 %v1095_v21, 0.0  ;;  %v1099_v25 = vadd.f32 %v1098_v22, %v2933_v28 }
 0x2b3   :  { %v1100_v26 = vpop.f32.mrf.mxu1 }
 0x2b4   :  { %v1101_v27 = vadd.f32 %v1100_v26, %v2935_v29  ;;  %1431 = vmatprep.mubr.f32.mxu0 %v1208_v23  ;;  %v1209_v31 = vmax.f32 %v1099_v25, 0.0 }
 0x2b5   :  { %v1104_v45 = vpop.f32.mrf.mxu1  ;;  %1432 = vmatmul.mubr.f32.gmra.mxu0 %v1207_v24 }
 0x2b6   :  { %v1210_v30 = vmax.f32 %v1101_v27, 0.0  ;;  %v1105_v18 = vadd.f32 %v1104_v45, %v2933_v28 }
 0x2b7   :  { %v1106_v32 = vpop.f32.mrf.mxu1 }
 0x2b8   :  { %v1107_v33 = vadd.f32 %v1106_v32, %v2935_v29  ;;  %1436 = vmatprep.mubr.f32.mxu0 %v1210_v30  ;;  %v1211_v36 = vmax.f32 %v1105_v18, 0.0 }
 0x2b9   :  { %v1110_v34 = vpop.f32.mrf.mxu1  ;;  %1437 = vmatmul.mubr.f32.gmra.mxu0 %v1209_v31 }
 0x2ba   :  { %v1212_v35 = vmax.f32 %v1107_v33, 0.0  ;;  %v1111_v37 = vadd.f32 %v1110_v34, %v2933_v28  ;;  %v3004_v34 = vld [vmem:[%s3049_s8] ss:$0 sm:$0xff]  ;;  %s2283_s8 = smov [#allocation2]  }
 0x2bb   :  { %v1112_v38 = vpop.f32.mrf.mxu1  ;;  %s1726_s28 = sshll.u32 %s2283_s8, 4  ;;  %s1727_s28 = int_to_ptr.vmem [resolvable:$true] %s1726_s28 }
 0x2bc   :  { %v1113_v39 = vadd.f32 %v1112_v38, %v2935_v29  ;;  %1441 = vmatprep.mubr.f32.mxu0 %v1212_v35  ;;  %v1213_v42 = vmax.f32 %v1111_v37, 0.0  ;;  %s2260_s0 = scalar_lea.vmem %s1727_s28, 4096  ;;  %p2265_p1 = scmp.lt.s32.totalorder %s1727_s28, %s1727_s28 }
 0x2bd   :  { %v1116_v40 = vpop.f32.mrf.mxu1  ;;  %1442 = vmatmul.mubr.f32.gmra.mxu0 %v1211_v36  ;;  %p2261_p0 = scmp.ne.s32.totalorder %s1727_s28, %s2260_s0  ;;  %p2266_p2 = scmp.lt.s32.totalorder %s2260_s0, %s2260_s0 }
 0x2be   :  { %v1214_v41 = vmax.f32 %v1113_v39, 0.0  ;;  %v1117_v43 = vadd.f32 %v1116_v40, %v2933_v28 }
 0x2bf   :  { %v1118_v44 = vpop.f32.mrf.mxu1  ;;  %p2267_p3 = por %p2266_p2, %p2265_p1 }
 0x2c0   :  { %v1119_v46 = vadd.f32 %v1118_v44, %v2935_v29  ;;  %1446 = vmatprep.mubr.f32.mxu0 %v1214_v41  ;;  %v1215_v49 = vmax.f32 %v1117_v43, 0.0 }
 0x2c1   :  { %v1122_v47 = vpop.f32.mrf.mxu1  ;;  %1447 = vmatmul.mubr.f32.gmra.mxu0 %v1213_v42  ;;  %p2268_p4 = pnand %p2267_p3, %p2261_p0 }
 0x2c2   :  { %v1216_v48 = vmax.f32 %v1119_v46, 0.0  ;;  %v1123_v50 = vadd.f32 %v1122_v47, %v2933_v28 }
 0x2c3   :  { %v1124_v51 = vpop.f32.mrf.mxu1 }
 0x2c4   :  { %v1125_v52 = vadd.f32 %v1124_v51, %v2935_v29  ;;  %1451 = vmatprep.mubr.f32.mxu0 %v1216_v48  ;;  %v1217_v55 = vmax.f32 %v1123_v50, 0.0 }
 0x2c5   :  { %v1128_v53 = vpop.f32.mrf.mxu1  ;;  %1452 = vmatmul.mubr.f32.gmra.mxu0 %v1215_v49 }
 0x2c6   :  { %v1218_v54 = vmax.f32 %v1125_v52, 0.0  ;;  %v1129_v56 = vadd.f32 %v1128_v53, %v2933_v28 }
 0x2c7   :  { %v1130_v57 = vpop.f32.mrf.mxu1 }
 0x2c8   :  { %v1131_v58 = vadd.f32 %v1130_v57, %v2935_v29  ;;  %1456 = vmatprep.mubr.f32.mxu0 %v1218_v54  ;;  %v1219_v61 = vmax.f32 %v1129_v56, 0.0 }
 0x2c9   :  { %v1134_v59 = vpop.f32.mrf.mxu1  ;;  %1457 = vmatmul.mubr.f32.gmra.mxu0 %v1217_v55 }
 0x2ca   :  { %v1220_v60 = vmax.f32 %v1131_v58, 0.0  ;;  %v1135_v62 = vadd.f32 %v1134_v59, %v2933_v28 }
 0x2cb   :  { %v1136_v63 = vpop.f32.mrf.mxu1 }
 0x2cc   :  { %v1137_v0 = vadd.f32 %v1136_v63, %v2935_v29  ;;  %1461 = vmatprep.mubr.f32.mxu0 %v1220_v60  ;;  %v1221_v3 = vmax.f32 %v1135_v62, 0.0 }
 0x2cd   :  { %v1140_v1 = vpop.f32.mrf.mxu1  ;;  %1462 = vmatmul.mubr.f32.gmra.mxu0 %v1219_v61 }
 0x2ce   :  { %v1222_v2 = vmax.f32 %v1137_v0, 0.0  ;;  %v1141_v4 = vadd.f32 %v1140_v1, %v2933_v28 }
 0x2cf   :  { %v1142_v5 = vpop.f32.mrf.mxu1 }
 0x2d0   :  { %v1143_v6 = vadd.f32 %v1142_v5, %v2935_v29  ;;  %1466 = vmatprep.mubr.f32.mxu0 %v1222_v2  ;;  %v1223_v9 = vmax.f32 %v1141_v4, 0.0 }
 0x2d1   :  { %v1146_v7 = vpop.f32.mrf.mxu1  ;;  %1467 = vmatmul.mubr.f32.gmra.mxu0 %v1221_v3 }
 0x2d2   :  { %v1224_v8 = vmax.f32 %v1143_v6, 0.0  ;;  %v1147_v10 = vadd.f32 %v1146_v7, %v2933_v28 }
 0x2d3   :  { %v1148_v11 = vpop.f32.mrf.mxu1 }
 0x2d4   :  { %v1149_v12 = vadd.f32 %v1148_v11, %v2935_v29  ;;  %1471 = vmatprep.mubr.f32.mxu0 %v1224_v8  ;;  %v1225_v15 = vmax.f32 %v1147_v10, 0.0 }
 0x2d5   :  { %v1152_v13 = vpop.f32.mrf.mxu1  ;;  %1472 = vmatmul.mubr.f32.gmra.mxu0 %v1223_v9 }
 0x2d6   :  { %v1226_v14 = vmax.f32 %v1149_v12, 0.0  ;;  %v1153_v16 = vadd.f32 %v1152_v13, %v2933_v28 }
 0x2d7   :  { %v1154_v17 = vpop.f32.mrf.mxu1 }
 0x2d8   :  { %v1155_v19 = vadd.f32 %v1154_v17, %v2935_v29  ;;  %1476 = vmatprep.mubr.f32.mxu0 %v1226_v14  ;;  %v1227_v22 = vmax.f32 %v1153_v16, 0.0 }
 0x2d9   :  { %v1158_v20 = vpop.f32.mrf.mxu1  ;;  %1477 = vmatmul.mubr.f32.gmra.mxu0 %v1225_v15 }
 0x2da   :  { %v1228_v21 = vmax.f32 %v1155_v19, 0.0  ;;  %v1159_v23 = vadd.f32 %v1158_v20, %v2933_v28 }
 0x2db   :  { %v1160_v24 = vpop.f32.mrf.mxu1 }
 0x2dc   :  { %v1161_v25 = vadd.f32 %v1160_v24, %v2935_v29  ;;  %1481 = vmatprep.mubr.f32.mxu0 %v1228_v21  ;;  %v1229_v45 = vmax.f32 %v1159_v23, 0.0 }
 0x2dd   :  { %v1164_v26 = vpop.f32.mrf.mxu1  ;;  %1482 = vmatmul.mubr.f32.gmra.mxu0 %v1227_v22 }
 0x2de   :  { %v1230_v27 = vmax.f32 %v1161_v25, 0.0  ;;  %v1165_v30 = vadd.f32 %v1164_v26, %v2933_v28 }
 0x2df   :  { %v1166_v31 = vpop.f32.mrf.mxu1 }
 0x2e0   :  { %v1167_v18 = vadd.f32 %v1166_v31, %v2935_v29  ;;  %1486 = vmatprep.mubr.f32.mxu0 %v1230_v27  ;;  %v1231_v33 = vmax.f32 %v1165_v30, 0.0 }
 0x2e1   :  { %1487 = vmatmul.mubr.f32.gmra.mxu0 %v1229_v45 }
 0x2e2   :  { %v1232_v32 = vmax.f32 %v1167_v18, 0.0 }
 0x2e4   :  { %1491 = vmatprep.mubr.f32.mxu1 %v1232_v32 }
 0x2e5   :  { %1492 = vmatmul.mubr.f32.vlgmr.msra.gmra.mxu1 %v1231_v33 }
 0x329   :  { %v1338_v35 = vpop.f32.mrf.mxu0 }
 0x32a   :  { %v1339_v36 = vadd.f32 %v3004_v34, %v1338_v35 }
 0x32b   :  { %v1340_v37 = vpop.f32.mrf.mxu0 }
 0x32c   :  { %v1836_v38 = vmul.f32 -1.442695, %v1339_v36 }
 0x32d   :  { %v1343_v28 = vpop.f32.mrf.mxu0 }
 0x32e   :  { %2132 = vpow2.f32 %v1836_v38  ;;  %v1344_v29 = vadd.f32 %v3004_v34, %v1343_v28 }
 0x32f   :  { %v1345_v39 = vpop.f32.mrf.mxu0 }
 0x330   :  { %v1837_v40 = vmul.f32 -1.442695, %v1344_v29 }
 0x331   :  { %v1348_v41 = vpop.f32.mrf.mxu0 }
 0x332   :  { %2134 = vpow2.f32 %v1837_v40  ;;  %v1349_v42 = vadd.f32 %v3004_v34, %v1348_v41 }
 0x333   :  { %v1350_v43 = vpop.f32.mrf.mxu0 }
 0x334   :  { %v1838_v44 = vmul.f32 -1.442695, %v1349_v42 }
 0x335   :  { %v1353_v46 = vpop.f32.mrf.mxu0 }
 0x336   :  { %2136 = vpow2.f32 %v1838_v44  ;;  %v1354_v47 = vadd.f32 %v3004_v34, %v1353_v46 }
 0x337   :  { %v1355_v48 = vpop.f32.mrf.mxu0 }
 0x338   :  { %v1839_v49 = vmul.f32 -1.442695, %v1354_v47 }
 0x339   :  { %v1358_v50 = vpop.f32.mrf.mxu0 }
 0x33a   :  { %2138 = vpow2.f32 %v1839_v49  ;;  %v1359_v51 = vadd.f32 %v3004_v34, %v1358_v50 }
 0x33b   :  { %v2133_v52 = vpop.eup %2132  ;;  %v1360_v53 = vpop.f32.mrf.mxu0 }
 0x33c   :  { %v1593_v54 = vadd.f32 1.0, %v2133_v52  ;;  %v1840_v55 = vmul.f32 -1.442695, %v1359_v51 }
 0x33d   :  { %v1363_v56 = vpop.f32.mrf.mxu0 }
 0x33e   :  { %2140 = vrcp.f32 %v1593_v54  ;;  %v1364_v57 = vadd.f32 %v3004_v34, %v1363_v56 }
 0x33f   :  { %v2135_v58 = vpop.eup %2134  ;;  %2142 = vpow2.f32 %v1840_v55  ;;  %v1365_v59 = vpop.f32.mrf.mxu0 }
 0x340   :  { %v1594_v60 = vadd.f32 1.0, %v2135_v58  ;;  %v1841_v61 = vmul.f32 -1.442695, %v1364_v57 }
 0x341   :  { %v1368_v62 = vpop.f32.mrf.mxu0 }
 0x342   :  { %2144 = vrcp.f32 %v1594_v60  ;;  %v1369_v63 = vadd.f32 %v3004_v34, %v1368_v62 }
 0x343   :  { %v2137_v0 = vpop.eup %2136  ;;  %2146 = vpow2.f32 %v1841_v61  ;;  %v1370_v1 = vpop.f32.mrf.mxu0 }
 0x344   :  { %v1595_v2 = vadd.f32 1.0, %v2137_v0  ;;  %v1842_v3 = vmul.f32 -1.442695, %v1369_v63 }
 0x345   :  { %v1373_v4 = vpop.f32.mrf.mxu0 }
 0x346   :  { %2148 = vrcp.f32 %v1595_v2  ;;  %v1374_v5 = vadd.f32 %v3004_v34, %v1373_v4 }
 0x347   :  { %v2139_v6 = vpop.eup %2138  ;;  %2150 = vpow2.f32 %v1842_v3  ;;  %v1375_v7 = vpop.f32.mrf.mxu0 }
 0x348   :  { %v1596_v8 = vadd.f32 1.0, %v2139_v6  ;;  %v1843_v9 = vmul.f32 -1.442695, %v1374_v5 }
 0x349   :  { %v1378_v10 = vpop.f32.mrf.mxu0 }
 0x34a   :  { %2152 = vrcp.f32 %v1596_v8  ;;  %v1379_v11 = vadd.f32 %v3004_v34, %v1378_v10 }
 0x34b   :  { %v2141_v12 = vpop.eup %2140  ;;  %2154 = vpow2.f32 %v1843_v9  ;;  %v1380_v13 = vpop.f32.mrf.mxu0 }
 0x34c   :  { %v2143_v14 = vpop.eup %2142  ;;  %1689 = vst [vmem:[#allocation2] sm:$0xff] %v2141_v12  ;;  %v1844_v15 = vmul.f32 -1.442695, %v1379_v11 }
 0x34d   :  { %v1597_v16 = vadd.f32 1.0, %v2143_v14  ;;  %v1383_v17 = vpop.f32.mrf.mxu0 }
 0x34e   :  { %2156 = vpow2.f32 %v1844_v15  ;;  %v1384_v19 = vadd.f32 %v3004_v34, %v1383_v17 }
 0x34f   :  { %v2145_v20 = vpop.eup %2144  ;;  %2158 = vrcp.f32 %v1597_v16  ;;  %v1385_v21 = vpop.f32.mrf.mxu0 }
 0x350   :  { %v2147_v22 = vpop.eup %2146  ;;  %1690 = vst [vmem:[#allocation2 + $0x8] sm:$0xff] %v2145_v20  ;;  %v1845_v23 = vmul.f32 -1.442695, %v1384_v19 }
 0x351   :  { %v1598_v24 = vadd.f32 1.0, %v2147_v22  ;;  %v1388_v25 = vpop.f32.mrf.mxu0 }
 0x352   :  { %2160 = vpow2.f32 %v1845_v23  ;;  %v1389_v26 = vadd.f32 %v3004_v34, %v1388_v25 }
 0x353   :  { %v2149_v27 = vpop.eup %2148  ;;  %2162 = vrcp.f32 %v1598_v24  ;;  %v1390_v45 = vpop.f32.mrf.mxu0 }
 0x354   :  { %v2151_v30 = vpop.eup %2150  ;;  %1691 = vst [vmem:[#allocation2 + $0x10] sm:$0xff] %v2149_v27  ;;  %v1846_v31 = vmul.f32 -1.442695, %v1389_v26 }
 0x355   :  { %v1599_v18 = vadd.f32 1.0, %v2151_v30  ;;  %v1393_v32 = vpop.f32.mrf.mxu0 }
 0x356   :  { %2164 = vpow2.f32 %v1846_v31  ;;  %v1394_v33 = vadd.f32 %v3004_v34, %v1393_v32 }
 0x357   :  { %v2153_v35 = vpop.eup %2152  ;;  %2166 = vrcp.f32 %v1599_v18  ;;  %v1395_v36 = vpop.f32.mrf.mxu0 }
 0x358   :  { %v2155_v37 = vpop.eup %2154  ;;  %1692 = vst [vmem:[#allocation2 + $0x18] sm:$0xff] %v2153_v35  ;;  %v1847_v38 = vmul.f32 -1.442695, %v1394_v33 }
 0x359   :  { %v1600_v28 = vadd.f32 1.0, %v2155_v37  ;;  %v1398_v29 = vpop.f32.mrf.mxu0 }
 0x35a   :  { %2168 = vpow2.f32 %v1847_v38  ;;  %v1399_v39 = vadd.f32 %v3004_v34, %v1398_v29 }
 0x35b   :  { %v2157_v40 = vpop.eup %2156  ;;  %2170 = vrcp.f32 %v1600_v28  ;;  %v1400_v41 = vpop.f32.mrf.mxu0 }
 0x35c   :  { %v2159_v42 = vpop.eup %2158  ;;  %v1601_v43 = vadd.f32 1.0, %v2157_v40  ;;  %v1848_v44 = vmul.f32 -1.442695, %v1399_v39 }
 0x35d   :  { %1693 = vst [vmem:[#allocation2 + $0x20] sm:$0xff] %v2159_v42  ;;  %v1403_v46 = vpop.f32.mrf.mxu0 }
 0x35e   :  { %2172 = vrcp.f32 %v1601_v43  ;;  %v1404_v47 = vadd.f32 %v3004_v34, %v1403_v46 }
 0x35f   :  { %v2161_v48 = vpop.eup %2160  ;;  %2174 = vpow2.f32 %v1848_v44  ;;  %v1405_v49 = vpop.f32.mrf.mxu0 }
 0x360   :  { %v2163_v50 = vpop.eup %2162  ;;  %v1602_v51 = vadd.f32 1.0, %v2161_v48  ;;  %v1849_v52 = vmul.f32 -1.442695, %v1404_v47 }
 0x361   :  { %1694 = vst [vmem:[#allocation2 + $0x28] sm:$0xff] %v2163_v50  ;;  %v1408_v53 = vpop.f32.mrf.mxu0 }
 0x362   :  { %2176 = vrcp.f32 %v1602_v51  ;;  %v1409_v54 = vadd.f32 %v3004_v34, %v1408_v53 }
 0x363   :  { %v2165_v55 = vpop.eup %2164  ;;  %2178 = vpow2.f32 %v1849_v52  ;;  %v1410_v56 = vpop.f32.mrf.mxu0 }
 0x364   :  { %v2167_v57 = vpop.eup %2166  ;;  %v1603_v58 = vadd.f32 1.0, %v2165_v55  ;;  %v1850_v59 = vmul.f32 -1.442695, %v1409_v54 }
 0x365   :  { %1695 = vst [vmem:[#allocation2 + $0x30] sm:$0xff] %v2167_v57  ;;  %v1413_v60 = vpop.f32.mrf.mxu0 }
 0x366   :  { %2180 = vrcp.f32 %v1603_v58  ;;  %v1414_v61 = vadd.f32 %v3004_v34, %v1413_v60 }
 0x367   :  { %v2169_v62 = vpop.eup %2168  ;;  %2182 = vpow2.f32 %v1850_v59  ;;  %v1415_v63 = vpop.f32.mrf.mxu0 }
 0x368   :  { %v2171_v0 = vpop.eup %2170  ;;  %v1604_v1 = vadd.f32 1.0, %v2169_v62  ;;  %v1851_v2 = vmul.f32 -1.442695, %v1414_v61 }
 0x369   :  { %1696 = vst [vmem:[#allocation2 + $0x38] sm:$0xff] %v2171_v0  ;;  %v1418_v3 = vpop.f32.mrf.mxu0 }
 0x36a   :  { %2184 = vrcp.f32 %v1604_v1  ;;  %v1419_v4 = vadd.f32 %v3004_v34, %v1418_v3 }
 0x36b   :  { %v2173_v5 = vpop.eup %2172  ;;  %2186 = vpow2.f32 %v1851_v2  ;;  %v1420_v6 = vpop.f32.mrf.mxu0 }
 0x36c   :  { %v2175_v7 = vpop.eup %2174  ;;  %1697 = vst [vmem:[#allocation2 + $0x40] sm:$0xff] %v2173_v5  ;;  %v1852_v8 = vmul.f32 -1.442695, %v1419_v4 }
 0x36d   :  { %v1605_v9 = vadd.f32 1.0, %v2175_v7  ;;  %v1423_v10 = vpop.f32.mrf.mxu0 }
 0x36e   :  { %2188 = vpow2.f32 %v1852_v8  ;;  %v1424_v11 = vadd.f32 %v3004_v34, %v1423_v10 }
 0x36f   :  { %v2177_v12 = vpop.eup %2176  ;;  %2190 = vrcp.f32 %v1605_v9  ;;  %v1425_v13 = vpop.f32.mrf.mxu0 }
 0x370   :  { %v2179_v14 = vpop.eup %2178  ;;  %1698 = vst [vmem:[#allocation2 + $0x48] sm:$0xff] %v2177_v12  ;;  %v1853_v15 = vmul.f32 -1.442695, %v1424_v11 }
 0x371   :  { %v1606_v16 = vadd.f32 1.0, %v2179_v14  ;;  %v1428_v17 = vpop.f32.mrf.mxu0 }
 0x372   :  { %2192 = vpow2.f32 %v1853_v15  ;;  %v1429_v19 = vadd.f32 %v3004_v34, %v1428_v17 }
 0x373   :  { %v2181_v20 = vpop.eup %2180  ;;  %2194 = vrcp.f32 %v1606_v16  ;;  %v1430_v21 = vpop.f32.mrf.mxu0 }
 0x374   :  { %v2183_v22 = vpop.eup %2182  ;;  %1699 = vst [vmem:[#allocation2 + $0x50] sm:$0xff] %v2181_v20  ;;  %v1854_v23 = vmul.f32 -1.442695, %v1429_v19 }
 0x375   :  { %v1607_v24 = vadd.f32 1.0, %v2183_v22  ;;  %v1433_v25 = vpop.f32.mrf.mxu0 }
 0x376   :  { %2196 = vpow2.f32 %v1854_v23  ;;  %v1434_v26 = vadd.f32 %v3004_v34, %v1433_v25 }
 0x377   :  { %v2185_v27 = vpop.eup %2184  ;;  %2198 = vrcp.f32 %v1607_v24  ;;  %v1435_v45 = vpop.f32.mrf.mxu0 }
 0x378   :  { %v2187_v30 = vpop.eup %2186  ;;  %1700 = vst [vmem:[#allocation2 + $0x58] sm:$0xff] %v2185_v27  ;;  %v1855_v31 = vmul.f32 -1.442695, %v1434_v26 }
 0x379   :  { %v1608_v18 = vadd.f32 1.0, %v2187_v30  ;;  %v1438_v32 = vpop.f32.mrf.mxu0 }
 0x37a   :  { %2200 = vpow2.f32 %v1855_v31  ;;  %v1439_v33 = vadd.f32 %v3004_v34, %v1438_v32 }
 0x37b   :  { %v2189_v35 = vpop.eup %2188  ;;  %2202 = vrcp.f32 %v1608_v18  ;;  %v1440_v36 = vpop.f32.mrf.mxu0 }
 0x37c   :  { %v2191_v37 = vpop.eup %2190  ;;  %v1609_v38 = vadd.f32 1.0, %v2189_v35  ;;  %v1856_v28 = vmul.f32 -1.442695, %v1439_v33 }
 0x37d   :  { %1701 = vst [vmem:[#allocation2 + $0x60] sm:$0xff] %v2191_v37  ;;  %v1443_v29 = vpop.f32.mrf.mxu0 }
 0x37e   :  { %2204 = vrcp.f32 %v1609_v38  ;;  %v1444_v39 = vadd.f32 %v3004_v34, %v1443_v29 }
 0x37f   :  { %v2193_v40 = vpop.eup %2192  ;;  %2206 = vpow2.f32 %v1856_v28  ;;  %v1445_v41 = vpop.f32.mrf.mxu0 }
 0x380   :  { %v2195_v42 = vpop.eup %2194  ;;  %v1610_v43 = vadd.f32 1.0, %v2193_v40  ;;  %v1857_v44 = vmul.f32 -1.442695, %v1444_v39 }
 0x381   :  { %1702 = vst [vmem:[#allocation2 + $0x68] sm:$0xff] %v2195_v42  ;;  %v1448_v46 = vpop.f32.mrf.mxu0 }
 0x382   :  { %2208 = vrcp.f32 %v1610_v43  ;;  %v1449_v47 = vadd.f32 %v3004_v34, %v1448_v46 }
 0x383   :  { %v2197_v48 = vpop.eup %2196  ;;  %2210 = vpow2.f32 %v1857_v44  ;;  %v1450_v49 = vpop.f32.mrf.mxu0 }
 0x384   :  { %v2199_v50 = vpop.eup %2198  ;;  %v1611_v51 = vadd.f32 1.0, %v2197_v48  ;;  %v1858_v52 = vmul.f32 -1.442695, %v1449_v47 }
 0x385   :  { %1703 = vst [vmem:[#allocation2 + $0x70] sm:$0xff] %v2199_v50  ;;  %v1453_v53 = vpop.f32.mrf.mxu0 }
 0x386   :  { %2212 = vrcp.f32 %v1611_v51  ;;  %v1454_v54 = vadd.f32 %v3004_v34, %v1453_v53 }
 0x387   :  { %v2201_v55 = vpop.eup %2200  ;;  %2214 = vpow2.f32 %v1858_v52  ;;  %v1455_v56 = vpop.f32.mrf.mxu0 }
 0x388   :  { %v2203_v57 = vpop.eup %2202  ;;  %v1612_v58 = vadd.f32 1.0, %v2201_v55  ;;  %v1859_v59 = vmul.f32 -1.442695, %v1454_v54 }
 0x389   :  { %1704 = vst [vmem:[#allocation2 + $0x78] sm:$0xff] %v2203_v57  ;;  %v1458_v60 = vpop.f32.mrf.mxu0 }
 0x38a   :  { %2216 = vrcp.f32 %v1612_v58  ;;  %v1459_v61 = vadd.f32 %v3004_v34, %v1458_v60 }
 0x38b   :  { %v2205_v62 = vpop.eup %2204  ;;  %2218 = vpow2.f32 %v1859_v59  ;;  %v1460_v63 = vpop.f32.mrf.mxu0 }
 0x38c   :  { %v2207_v0 = vpop.eup %2206  ;;  %1705 = vst [vmem:[#allocation2 + $0x80] sm:$0xff] %v2205_v62  ;;  %v1860_v1 = vmul.f32 -1.442695, %v1459_v61 }
 0x38d   :  { %v1613_v2 = vadd.f32 1.0, %v2207_v0  ;;  %v1463_v3 = vpop.f32.mrf.mxu0 }
 0x38e   :  { %2220 = vpow2.f32 %v1860_v1  ;;  %v1464_v4 = vadd.f32 %v3004_v34, %v1463_v3 }
 0x38f   :  { %v2209_v5 = vpop.eup %2208  ;;  %2222 = vrcp.f32 %v1613_v2  ;;  %v1465_v6 = vpop.f32.mrf.mxu0 }
 0x390   :  { %v2211_v7 = vpop.eup %2210  ;;  %1706 = vst [vmem:[#allocation2 + $0x88] sm:$0xff] %v2209_v5  ;;  %v1861_v8 = vmul.f32 -1.442695, %v1464_v4 }
 0x391   :  { %v1614_v9 = vadd.f32 1.0, %v2211_v7  ;;  %v1468_v10 = vpop.f32.mrf.mxu0 }
 0x392   :  { %2224 = vpow2.f32 %v1861_v8  ;;  %v1469_v11 = vadd.f32 %v3004_v34, %v1468_v10 }
 0x393   :  { %v2213_v12 = vpop.eup %2212  ;;  %2226 = vrcp.f32 %v1614_v9  ;;  %v1470_v13 = vpop.f32.mrf.mxu0 }
 0x394   :  { %v2215_v14 = vpop.eup %2214  ;;  %1707 = vst [vmem:[#allocation2 + $0x90] sm:$0xff] %v2213_v12  ;;  %v1862_v15 = vmul.f32 -1.442695, %v1469_v11 }
 0x395   :  { %v1615_v16 = vadd.f32 1.0, %v2215_v14  ;;  %v1473_v17 = vpop.f32.mrf.mxu0 }
 0x396   :  { %2228 = vpow2.f32 %v1862_v15  ;;  %v1474_v19 = vadd.f32 %v3004_v34, %v1473_v17 }
 0x397   :  { %v2217_v20 = vpop.eup %2216  ;;  %2230 = vrcp.f32 %v1615_v16  ;;  %v1475_v21 = vpop.f32.mrf.mxu0 }
 0x398   :  { %v2219_v22 = vpop.eup %2218  ;;  %1708 = vst [vmem:[#allocation2 + $0x98] sm:$0xff] %v2217_v20  ;;  %v1863_v23 = vmul.f32 -1.442695, %v1474_v19 }
 0x399   :  { %v1616_v24 = vadd.f32 1.0, %v2219_v22  ;;  %v1478_v25 = vpop.f32.mrf.mxu0 }
 0x39a   :  { %2232 = vpow2.f32 %v1863_v23  ;;  %v1479_v26 = vadd.f32 %v3004_v34, %v1478_v25 }
 0x39b   :  { %v2221_v27 = vpop.eup %2220  ;;  %2234 = vrcp.f32 %v1616_v24  ;;  %v1480_v45 = vpop.f32.mrf.mxu0 }
 0x39c   :  { %v2223_v30 = vpop.eup %2222  ;;  %v1617_v31 = vadd.f32 1.0, %v2221_v27  ;;  %v1864_v18 = vmul.f32 -1.442695, %v1479_v26 }
 0x39d   :  { %1709 = vst [vmem:[#allocation2 + $0xa0] sm:$0xff] %v2223_v30  ;;  %v1483_v32 = vpop.f32.mrf.mxu0 }
 0x39e   :  { %2236 = vrcp.f32 %v1617_v31  ;;  %v1484_v33 = vadd.f32 %v3004_v34, %v1483_v32 }
 0x39f   :  { %v2225_v35 = vpop.eup %2224  ;;  %2238 = vpow2.f32 %v1864_v18  ;;  %v1485_v36 = vpop.f32.mrf.mxu0 }
 0x3a0   :  { %v2227_v37 = vpop.eup %2226  ;;  %v1618_v38 = vadd.f32 1.0, %v2225_v35  ;;  %v1865_v28 = vmul.f32 -1.442695, %v1484_v33 }
 0x3a1   :  { %1710 = vst [vmem:[#allocation2 + $0xa8] sm:$0xff] %v2227_v37  ;;  %v1488_v29 = vpop.f32.mrf.mxu0 }
 0x3a2   :  { %2240 = vrcp.f32 %v1618_v38  ;;  %v1489_v39 = vadd.f32 %v3004_v34, %v1488_v29 }
 0x3a3   :  { %v2229_v40 = vpop.eup %2228  ;;  %2242 = vpow2.f32 %v1865_v28  ;;  %v1490_v41 = vpop.f32.mrf.mxu0 }
 0x3a4   :  { %v2231_v42 = vpop.eup %2230  ;;  %v1619_v43 = vadd.f32 1.0, %v2229_v40  ;;  %v1866_v44 = vmul.f32 -1.442695, %v1489_v39 }
 0x3a5   :  { %1711 = vst [vmem:[#allocation2 + $0xb0] sm:$0xff] %v2231_v42  ;;  %v1493_v46 = vpop.f32.mrf.mxu1 }
 0x3a6   :  { %2244 = vrcp.f32 %v1619_v43  ;;  %v1494_v47 = vadd.f32 %v3004_v34, %v1493_v46 }
 0x3a7   :  { %v2233_v48 = vpop.eup %2232  ;;  %2246 = vpow2.f32 %v1866_v44  ;;  %v1495_v49 = vpop.f32.mrf.mxu1 }
 0x3a8   :  { %v2235_v50 = vpop.eup %2234  ;;  %v1620_v51 = vadd.f32 1.0, %v2233_v48  ;;  %v1867_v52 = vmul.f32 -1.442695, %v1494_v47 }
 0x3a9   :  { %1712 = vst [vmem:[#allocation2 + $0xb8] sm:$0xff] %v2235_v50 }
 0x3aa   :  { %2248 = vrcp.f32 %v1620_v51 }
 0x3ab   :  { %v2237_v53 = vpop.eup %2236  ;;  %2250 = vpow2.f32 %v1867_v52 }
 0x3ac   :  { %v2239_v54 = vpop.eup %2238  ;;  %1713 = vst [vmem:[#allocation2 + $0xc0] sm:$0xff] %v2237_v53 }
 0x3ad   :  { %v1621_v55 = vadd.f32 1.0, %v2239_v54 }
 0x3af   :  { %v2241_v56 = vpop.eup %2240  ;;  %2252 = vrcp.f32 %v1621_v55 }
 0x3b0   :  { %v2243_v57 = vpop.eup %2242  ;;  %1714 = vst [vmem:[#allocation2 + $0xc8] sm:$0xff] %v2241_v56 }
 0x3b1   :  { %v1622_v58 = vadd.f32 1.0, %v2243_v57 }
 0x3b3   :  { %v2245_v59 = vpop.eup %2244  ;;  %2254 = vrcp.f32 %v1622_v58 }
 0x3b4   :  { %v2247_v34 = vpop.eup %2246  ;;  %1715 = vst [vmem:[#allocation2 + $0xd0] sm:$0xff] %v2245_v59 }
 0x3b5   :  { %v1623_v60 = vadd.f32 1.0, %v2247_v34 }
 0x3b7   :  { %v2249_v61 = vpop.eup %2248  ;;  %2256 = vrcp.f32 %v1623_v60 }
 0x3b8   :  { %v2251_v62 = vpop.eup %2250  ;;  %1716 = vst [vmem:[#allocation2 + $0xd8] sm:$0xff] %v2249_v61 }
 0x3b9   :  { %v1624_v63 = vadd.f32 1.0, %v2251_v62 }
 0x3bb   :  { %2258 = vrcp.f32 %v1624_v63 }
 0x3bc   :  { %v2253_v0 = vpop.eup %2252 }
 0x3bd   :  { %1717 = vst [vmem:[#allocation2 + $0xe0] sm:$0xff] %v2253_v0 }
 0x3c0   :  { %v2255_v1 = vpop.eup %2254 }
 0x3c1   :  { %1718 = vst [vmem:[#allocation2 + $0xe8] sm:$0xff] %v2255_v1 }
 0x3c4   :  { %v2257_v2 = vpop.eup %2256 }
 0x3c5   :  { %1719 = vst [vmem:[#allocation2 + $0xf0] sm:$0xff] %v2257_v2 }
 0x3c8   :  { %v2259_v3 = vpop.eup %2258 }
 0x3c9   :  { %1720 = vst [vmem:[#allocation2 + $0xf8] sm:$0xff] %v2259_v3 }
 0x3ca   :  { %2271 = shalt.err (!%p2268_p4)
}
 0x3cb   :  { %s2284_s29 = smov 128   ;;  %s2285_s30 = smov 8  }
 0x3cc   :  { %1732 = dma.vmem_to_hbm [thread:$0]  %s1727_s28, 4096, %s3050_s9, [#allocation3], %s2284_s29, %s2284_s29, %s2285_s30  }
 0x3cd   :  { %2280 = dma.done.wait [#allocation3], 4096  }
 0x3ce   :  { %2281 = vsyncadd [#allocation3], 4294963200 }
 0x3cf   :  { %1736 = vsyncpa [#allocation3], 1 }

</bundles_post_ra>
